<compile_context>
chip_gen: v6e
topology: v6e:2x2x1
jax: 0.10.0
libtpu: 0.0.40
codegen_flags: <defaults>
</compile_context>

<pallas_src>
import functools

import jax
import jax.numpy as jnp
from jax.experimental import pallas as pl
from jax.experimental.pallas import tpu as pltpu


def _lstm_bidir_kernel(x_ref,        # (T*B, D)   time-major flattened input
                       wih_ref,      # (D, 8H)    [wih_f | wih_b] lane-concat
                       b_ref,        # (1, 8H)    [b_f   | b_b  ]
                       whh_f_ref,    # (H, 4H)    forward recurrent weight
                       wout_ref,     # (2H, O)
                       bout_ref,     # (1, O)
                       out_ref,      # (B, O)
                       *, T, B):
    H = whh_f_ref.shape[0]

    # ---- hoisted input projection: both directions, all timesteps, one matmul ----
    # (T*B, D) @ (D, 8H) + (1, 8H). Forward gate pre-activations for step t are
    # rows [t*B, (t+1)*B) of lanes [0, 4H); the backward cell only ever processes
    # x[T-1] from the zero state (== lstm_out[:, -1, H:] in PyTorch), so its gate
    # pre-activation is the step-(T-1) rows of lanes [4H, 8H).  h0 @ whh_b == 0,
    # so the backward recurrent matmul (and whh_b itself) is dropped entirely.
    gproj = (jnp.dot(x_ref[...], wih_ref[...], preferred_element_type=jnp.float32)
             + b_ref[...])                                    # (T*B, 8H)

    # recurrent weight / output head loaded once, outside the recurrence
    whh_f = whh_f_ref[...]
    wout = wout_ref[...]

    def act(g, c):
        # PyTorch gate order: i, f, g, o
        i = jax.nn.sigmoid(g[:, 0 * H:1 * H])
        f = jax.nn.sigmoid(g[:, 1 * H:2 * H])
        gg = jnp.tanh(g[:, 2 * H:3 * H])
        o = jax.nn.sigmoid(g[:, 3 * H:4 * H])
        c_new = f * c + i * gg
        h_new = o * jnp.tanh(c_new)
        return h_new, c_new

    h = jnp.zeros((B, H), jnp.float32)
    c = jnp.zeros((B, H), jnp.float32)

    # ---- forward recurrence, fully unrolled (T is static) ----
    # Equivalent to lax.fori_loop(0, T, body, ..., unroll=True); writing it as a
    # static Python loop additionally makes every gate-slab slice static. Only the
    # (B,H)x(H,4H) h @ whh_f matmul remains on the serial critical path.
    # TODO(synk): could stage whh_f once in the MXU via pltpu.matmul_push_rhs /
    # matmul_acc_lhs / matmul_pop to avoid re-streaming the RHS every step.
    for t in range(T):
        g = gproj[t * B:(t + 1) * B, :4 * H] + jnp.dot(
            h, whh_f, preferred_element_type=jnp.float32)
        h, c = act(g, c)
    h_fwd = h

    # ---- backward direction: single step from the zero state ----
    h_bwd, _ = act(gproj[(T - 1) * B:T * B, 4 * H:],
                   jnp.zeros((B, H), jnp.float32))

    # ---- output head without a lane-axis concat: split wout into halves ----
    out_ref[...] = (
        jnp.dot(h_fwd, wout[:H, :], preferred_element_type=jnp.float32)
        + jnp.dot(h_bwd, wout[H:, :], preferred_element_type=jnp.float32)
        + bout_ref[...])


def lstm_model_forward(x, params):
    """x: (B, T, D) batch_first, like the PyTorch module."""
    B, T, D = x.shape
    H = params["whh_f"].shape[0]
    O = params["wout"].shape[1]

    # time-major flatten: row t*B + b holds x[b, t, :]
    x_flat = jnp.transpose(x, (1, 0, 2)).reshape(T * B, D)
    # both directions' input weights / biases concatenated on the lane axis so the
    # kernel does a single input-projection matmul; whh_b is not passed at all
    # (its contribution is exactly zero since h0 == 0).
    wih_cat = jnp.concatenate([params["wih_f"], params["wih_b"]], axis=1)  # (D, 8H)
    b_cat = jnp.concatenate([params["b_f"], params["b_b"]], axis=1)        # (1, 8H)

    vmem = pl.BlockSpec(memory_space=pltpu.MemorySpace.VMEM)
    return pl.pallas_call(
        functools.partial(_lstm_bidir_kernel, T=T, B=B),
        out_shape=jax.ShapeDtypeStruct((B, O), jnp.float32),
        in_specs=[vmem] * 6,
        out_specs=vmem,
    )(x_flat, wih_cat, b_cat, params["whh_f"], params["wout"], params["bout"])


def init_params(key, input_size=7, hidden=128, output_size=3):
    """Deterministic init, PyTorch-style U(-1/sqrt(H), 1/sqrt(H)).

    Weights are stored already transposed for the kernel:
      wih_*: (D, 4H), whh_*: (H, 4H), b_*: (1, 4H) = b_ih + b_hh, wout: (2H, O).
    """
    k = 1.0 / jnp.sqrt(jnp.float32(hidden))
    keys = jax.random.split(key, 11)

    def u(kk, shape):
        return jax.random.uniform(kk, shape, jnp.float32, -k, k)

    params = {
        "wih_f": u(keys[0], (input_size, 4 * hidden)),
        "whh_f": u(keys[1], (hidden, 4 * hidden)),
        "b_f": u(keys[2], (1, 4 * hidden)) + u(keys[3], (1, 4 * hidden)),
        "wih_b": u(keys[4], (input_size, 4 * hidden)),
        "whh_b": u(keys[5], (hidden, 4 * hidden)),
        "b_b": u(keys[6], (1, 4 * hidden)) + u(keys[7], (1, 4 * hidden)),
        "wout": u(keys[8], (2 * hidden, output_size)),
        "bout": u(keys[9], (1, output_size)),
    }
    return params


def reference_forward(x, params):
    """Pure-JAX reference of the PyTorch forward (float32)."""
    B, T, D = x.shape
    H = params["whh_f"].shape[0]

    def cell_step(x_t, h, c, wih, whh, b):
        g = x_t @ wih + h @ whh + b
        i = jax.nn.sigmoid(g[:, 0 * H:1 * H])
        f = jax.nn.sigmoid(g[:, 1 * H:2 * H])
        gg = jnp.tanh(g[:, 2 * H:3 * H])
        o = jax.nn.sigmoid(g[:, 3 * H:4 * H])
        c = f * c + i * gg
        h = o * jnp.tanh(c)
        return h, c

    h = jnp.zeros((B, H), jnp.float32)
    c = jnp.zeros((B, H), jnp.float32)
    for t in range(T):
        h, c = cell_step(x[:, t, :], h, c,
                         params["wih_f"], params["whh_f"], params["b_f"])
    h_fwd = h

    h_bwd, _ = cell_step(x[:, T - 1, :],
                         jnp.zeros((B, H), jnp.float32),
                         jnp.zeros((B, H), jnp.float32),
                         params["wih_b"], params["whh_b"], params["b_b"])

    feat = jnp.concatenate([h_fwd, h_bwd], axis=-1)
    return feat @ params["wout"] + params["bout"]


if __name__ == "__main__":
    B, T, D, H, O = 2, 8, 7, 128, 3
    key = jax.random.PRNGKey(0)
    k_x, k_p = jax.random.split(key)
    x = jax.random.normal(k_x, (B, T, D), jnp.float32)
    params = init_params(k_p, input_size=D, hidden=H, output_size=O)

    out = lstm_model_forward(x, params)
    out = jax.block_until_ready(out)

    ref = reference_forward(x, params)
    assert out.shape == (B, O)
    assert jnp.allclose(out, ref, atol=1e-4, rtol=1e-4), (out, ref)
    print("KERNEL_OK")
</pallas_src>

<mosaic_0001>
module attributes {stable_mosaic.version = 11 : i64} {
  func.func @_lstm_bidir_kernel(%arg0: memref<16x7xf32, #tpu.memory_space<vmem>>, %arg1: memref<7x1024xf32, #tpu.memory_space<vmem>>, %arg2: memref<1x1024xf32, #tpu.memory_space<vmem>>, %arg3: memref<128x512xf32, #tpu.memory_space<vmem>>, %arg4: memref<256x3xf32, #tpu.memory_space<vmem>>, %arg5: memref<1x3xf32, #tpu.memory_space<vmem>>, %arg6: memref<2x3xf32, #tpu.memory_space<vmem>>) attributes {dimension_semantics = [], scalar_prefetch = 0 : i64, scratch_operands = 0 : i64, tpu.core_type = #tpu.core_type<tc>} {
    %c0 = arith.constant 0 : index
    %c0_0 = arith.constant 0 : index
    %0 = vector.load %arg0[%c0, %c0_0] : memref<16x7xf32, #tpu.memory_space<vmem>>, vector<16x7xf32>
    %c0_1 = arith.constant 0 : index
    %c0_2 = arith.constant 0 : index
    %1 = vector.load %arg1[%c0_1, %c0_2] : memref<7x1024xf32, #tpu.memory_space<vmem>>, vector<7x1024xf32>
    %cst = arith.constant dense<0.000000e+00> : vector<16x1024xf32>
    %2 = tpu.matmul %0, %1, %cst {dimension_numbers = #tpu.dot_dimension_numbers<[1], [0], [0], [1], [0, 0, 1, 1], [], []>} : vector<16x7xf32>, vector<7x1024xf32>, vector<16x1024xf32> -> vector<16x1024xf32>
    %c0_3 = arith.constant 0 : index
    %c0_4 = arith.constant 0 : index
    %3 = vector.load %arg2[%c0_3, %c0_4] : memref<1x1024xf32, #tpu.memory_space<vmem>>, vector<1x1024xf32>
    %4 = vector.broadcast %3 : vector<1x1024xf32> to vector<16x1024xf32>
    %5 = arith.addf %2, %4 : vector<16x1024xf32>
    %c0_5 = arith.constant 0 : index
    %c0_6 = arith.constant 0 : index
    %6 = vector.load %arg3[%c0_5, %c0_6] : memref<128x512xf32, #tpu.memory_space<vmem>>, vector<128x512xf32>
    %c0_7 = arith.constant 0 : index
    %c0_8 = arith.constant 0 : index
    %7 = vector.load %arg4[%c0_7, %c0_8] : memref<256x3xf32, #tpu.memory_space<vmem>>, vector<256x3xf32>
    %cst_9 = arith.constant 0.000000e+00 : f32
    %8 = vector.broadcast %cst_9 : f32 to vector<2x128xf32>
    %cst_10 = arith.constant 0.000000e+00 : f32
    %9 = vector.broadcast %cst_10 : f32 to vector<2x128xf32>
    %10 = vector.extract_strided_slice %5 {offsets = [0, 0], sizes = [2, 512], strides = [1, 1]} : vector<16x1024xf32> to vector<2x512xf32>
    %cst_11 = arith.constant dense<0.000000e+00> : vector<2x512xf32>
    %11 = tpu.matmul %8, %6, %cst_11 {dimension_numbers = #tpu.dot_dimension_numbers<[1], [0], [0], [1], [0, 0, 1, 1], [], []>} : vector<2x128xf32>, vector<128x512xf32>, vector<2x512xf32> -> vector<2x512xf32>
    %12 = arith.addf %10, %11 : vector<2x512xf32>
    %13 = vector.extract_strided_slice %12 {offsets = [0, 0], sizes = [2, 128], strides = [1, 1]} : vector<2x512xf32> to vector<2x128xf32>
    %14 = arith.negf %13 : vector<2x128xf32>
    %15 = math.exp %14 : vector<2x128xf32>
    %cst_12 = arith.constant 1.000000e+00 : f32
    %16 = vector.broadcast %cst_12 : f32 to vector<2x128xf32>
    %17 = arith.addf %16, %15 : vector<2x128xf32>
    %18 = arith.divf %16, %17 : vector<2x128xf32>
    %19 = vector.extract_strided_slice %12 {offsets = [0, 128], sizes = [2, 128], strides = [1, 1]} : vector<2x512xf32> to vector<2x128xf32>
    %20 = arith.negf %19 : vector<2x128xf32>
    %21 = math.exp %20 : vector<2x128xf32>
    %cst_13 = arith.constant 1.000000e+00 : f32
    %22 = vector.broadcast %cst_13 : f32 to vector<2x128xf32>
    %23 = arith.addf %22, %21 : vector<2x128xf32>
    %24 = arith.divf %22, %23 : vector<2x128xf32>
    %25 = vector.extract_strided_slice %12 {offsets = [0, 256], sizes = [2, 128], strides = [1, 1]} : vector<2x512xf32> to vector<2x128xf32>
    %26 = math.tanh %25 : vector<2x128xf32>
    %27 = vector.extract_strided_slice %12 {offsets = [0, 384], sizes = [2, 128], strides = [1, 1]} : vector<2x512xf32> to vector<2x128xf32>
    %28 = arith.negf %27 : vector<2x128xf32>
    %29 = math.exp %28 : vector<2x128xf32>
    %cst_14 = arith.constant 1.000000e+00 : f32
    %30 = vector.broadcast %cst_14 : f32 to vector<2x128xf32>
    %31 = arith.addf %30, %29 : vector<2x128xf32>
    %32 = arith.divf %30, %31 : vector<2x128xf32>
    %33 = arith.mulf %24, %9 : vector<2x128xf32>
    %34 = arith.mulf %18, %26 : vector<2x128xf32>
    %35 = arith.addf %33, %34 : vector<2x128xf32>
    %36 = math.tanh %35 : vector<2x128xf32>
    %37 = arith.mulf %32, %36 : vector<2x128xf32>
    %38 = vector.extract_strided_slice %5 {offsets = [2, 0], sizes = [2, 512], strides = [1, 1]} : vector<16x1024xf32> to vector<2x512xf32>
    %cst_15 = arith.constant dense<0.000000e+00> : vector<2x512xf32>
    %39 = tpu.matmul %37, %6, %cst_15 {dimension_numbers = #tpu.dot_dimension_numbers<[1], [0], [0], [1], [0, 0, 1, 1], [], []>} : vector<2x128xf32>, vector<128x512xf32>, vector<2x512xf32> -> vector<2x512xf32>
    %40 = arith.addf %38, %39 : vector<2x512xf32>
    %41 = vector.extract_strided_slice %40 {offsets = [0, 0], sizes = [2, 128], strides = [1, 1]} : vector<2x512xf32> to vector<2x128xf32>
    %42 = arith.negf %41 : vector<2x128xf32>
    %43 = math.exp %42 : vector<2x128xf32>
    %cst_16 = arith.constant 1.000000e+00 : f32
    %44 = vector.broadcast %cst_16 : f32 to vector<2x128xf32>
    %45 = arith.addf %44, %43 : vector<2x128xf32>
    %46 = arith.divf %44, %45 : vector<2x128xf32>
    %47 = vector.extract_strided_slice %40 {offsets = [0, 128], sizes = [2, 128], strides = [1, 1]} : vector<2x512xf32> to vector<2x128xf32>
    %48 = arith.negf %47 : vector<2x128xf32>
    %49 = math.exp %48 : vector<2x128xf32>
    %cst_17 = arith.constant 1.000000e+00 : f32
    %50 = vector.broadcast %cst_17 : f32 to vector<2x128xf32>
    %51 = arith.addf %50, %49 : vector<2x128xf32>
    %52 = arith.divf %50, %51 : vector<2x128xf32>
    %53 = vector.extract_strided_slice %40 {offsets = [0, 256], sizes = [2, 128], strides = [1, 1]} : vector<2x512xf32> to vector<2x128xf32>
    %54 = math.tanh %53 : vector<2x128xf32>
    %55 = vector.extract_strided_slice %40 {offsets = [0, 384], sizes = [2, 128], strides = [1, 1]} : vector<2x512xf32> to vector<2x128xf32>
    %56 = arith.negf %55 : vector<2x128xf32>
    %57 = math.exp %56 : vector<2x128xf32>
    %cst_18 = arith.constant 1.000000e+00 : f32
    %58 = vector.broadcast %cst_18 : f32 to vector<2x128xf32>
    %59 = arith.addf %58, %57 : vector<2x128xf32>
    %60 = arith.divf %58, %59 : vector<2x128xf32>
    %61 = arith.mulf %52, %35 : vector<2x128xf32>
    %62 = arith.mulf %46, %54 : vector<2x128xf32>
    %63 = arith.addf %61, %62 : vector<2x128xf32>
    %64 = math.tanh %63 : vector<2x128xf32>
    %65 = arith.mulf %60, %64 : vector<2x128xf32>
    %66 = vector.extract_strided_slice %5 {offsets = [4, 0], sizes = [2, 512], strides = [1, 1]} : vector<16x1024xf32> to vector<2x512xf32>
    %cst_19 = arith.constant dense<0.000000e+00> : vector<2x512xf32>
    %67 = tpu.matmul %65, %6, %cst_19 {dimension_numbers = #tpu.dot_dimension_numbers<[1], [0], [0], [1], [0, 0, 1, 1], [], []>} : vector<2x128xf32>, vector<128x512xf32>, vector<2x512xf32> -> vector<2x512xf32>
    %68 = arith.addf %66, %67 : vector<2x512xf32>
    %69 = vector.extract_strided_slice %68 {offsets = [0, 0], sizes = [2, 128], strides = [1, 1]} : vector<2x512xf32> to vector<2x128xf32>
    %70 = arith.negf %69 : vector<2x128xf32>
    %71 = math.exp %70 : vector<2x128xf32>
    %cst_20 = arith.constant 1.000000e+00 : f32
    %72 = vector.broadcast %cst_20 : f32 to vector<2x128xf32>
    %73 = arith.addf %72, %71 : vector<2x128xf32>
    %74 = arith.divf %72, %73 : vector<2x128xf32>
    %75 = vector.extract_strided_slice %68 {offsets = [0, 128], sizes = [2, 128], strides = [1, 1]} : vector<2x512xf32> to vector<2x128xf32>
    %76 = arith.negf %75 : vector<2x128xf32>
    %77 = math.exp %76 : vector<2x128xf32>
    %cst_21 = arith.constant 1.000000e+00 : f32
    %78 = vector.broadcast %cst_21 : f32 to vector<2x128xf32>
    %79 = arith.addf %78, %77 : vector<2x128xf32>
    %80 = arith.divf %78, %79 : vector<2x128xf32>
    %81 = vector.extract_strided_slice %68 {offsets = [0, 256], sizes = [2, 128], strides = [1, 1]} : vector<2x512xf32> to vector<2x128xf32>
    %82 = math.tanh %81 : vector<2x128xf32>
    %83 = vector.extract_strided_slice %68 {offsets = [0, 384], sizes = [2, 128], strides = [1, 1]} : vector<2x512xf32> to vector<2x128xf32>
    %84 = arith.negf %83 : vector<2x128xf32>
    %85 = math.exp %84 : vector<2x128xf32>
    %cst_22 = arith.constant 1.000000e+00 : f32
    %86 = vector.broadcast %cst_22 : f32 to vector<2x128xf32>
    %87 = arith.addf %86, %85 : vector<2x128xf32>
    %88 = arith.divf %86, %87 : vector<2x128xf32>
    %89 = arith.mulf %80, %63 : vector<2x128xf32>
    %90 = arith.mulf %74, %82 : vector<2x128xf32>
    %91 = arith.addf %89, %90 : vector<2x128xf32>
    %92 = math.tanh %91 : vector<2x128xf32>
    %93 = arith.mulf %88, %92 : vector<2x128xf32>
    %94 = vector.extract_strided_slice %5 {offsets = [6, 0], sizes = [2, 512], strides = [1, 1]} : vector<16x1024xf32> to vector<2x512xf32>
    %cst_23 = arith.constant dense<0.000000e+00> : vector<2x512xf32>
    %95 = tpu.matmul %93, %6, %cst_23 {dimension_numbers = #tpu.dot_dimension_numbers<[1], [0], [0], [1], [0, 0, 1, 1], [], []>} : vector<2x128xf32>, vector<128x512xf32>, vector<2x512xf32> -> vector<2x512xf32>
    %96 = arith.addf %94, %95 : vector<2x512xf32>
    %97 = vector.extract_strided_slice %96 {offsets = [0, 0], sizes = [2, 128], strides = [1, 1]} : vector<2x512xf32> to vector<2x128xf32>
    %98 = arith.negf %97 : vector<2x128xf32>
    %99 = math.exp %98 : vector<2x128xf32>
    %cst_24 = arith.constant 1.000000e+00 : f32
    %100 = vector.broadcast %cst_24 : f32 to vector<2x128xf32>
    %101 = arith.addf %100, %99 : vector<2x128xf32>
    %102 = arith.divf %100, %101 : vector<2x128xf32>
    %103 = vector.extract_strided_slice %96 {offsets = [0, 128], sizes = [2, 128], strides = [1, 1]} : vector<2x512xf32> to vector<2x128xf32>
    %104 = arith.negf %103 : vector<2x128xf32>
    %105 = math.exp %104 : vector<2x128xf32>
    %cst_25 = arith.constant 1.000000e+00 : f32
    %106 = vector.broadcast %cst_25 : f32 to vector<2x128xf32>
    %107 = arith.addf %106, %105 : vector<2x128xf32>
    %108 = arith.divf %106, %107 : vector<2x128xf32>
    %109 = vector.extract_strided_slice %96 {offsets = [0, 256], sizes = [2, 128], strides = [1, 1]} : vector<2x512xf32> to vector<2x128xf32>
    %110 = math.tanh %109 : vector<2x128xf32>
    %111 = vector.extract_strided_slice %96 {offsets = [0, 384], sizes = [2, 128], strides = [1, 1]} : vector<2x512xf32> to vector<2x128xf32>
    %112 = arith.negf %111 : vector<2x128xf32>
    %113 = math.exp %112 : vector<2x128xf32>
    %cst_26 = arith.constant 1.000000e+00 : f32
    %114 = vector.broadcast %cst_26 : f32 to vector<2x128xf32>
    %115 = arith.addf %114, %113 : vector<2x128xf32>
    %116 = arith.divf %114, %115 : vector<2x128xf32>
    %117 = arith.mulf %108, %91 : vector<2x128xf32>
    %118 = arith.mulf %102, %110 : vector<2x128xf32>
    %119 = arith.addf %117, %118 : vector<2x128xf32>
    %120 = math.tanh %119 : vector<2x128xf32>
    %121 = arith.mulf %116, %120 : vector<2x128xf32>
    %122 = vector.extract_strided_slice %5 {offsets = [8, 0], sizes = [2, 512], strides = [1, 1]} : vector<16x1024xf32> to vector<2x512xf32>
    %cst_27 = arith.constant dense<0.000000e+00> : vector<2x512xf32>
    %123 = tpu.matmul %121, %6, %cst_27 {dimension_numbers = #tpu.dot_dimension_numbers<[1], [0], [0], [1], [0, 0, 1, 1], [], []>} : vector<2x128xf32>, vector<128x512xf32>, vector<2x512xf32> -> vector<2x512xf32>
    %124 = arith.addf %122, %123 : vector<2x512xf32>
    %125 = vector.extract_strided_slice %124 {offsets = [0, 0], sizes = [2, 128], strides = [1, 1]} : vector<2x512xf32> to vector<2x128xf32>
    %126 = arith.negf %125 : vector<2x128xf32>
    %127 = math.exp %126 : vector<2x128xf32>
    %cst_28 = arith.constant 1.000000e+00 : f32
    %128 = vector.broadcast %cst_28 : f32 to vector<2x128xf32>
    %129 = arith.addf %128, %127 : vector<2x128xf32>
    %130 = arith.divf %128, %129 : vector<2x128xf32>
    %131 = vector.extract_strided_slice %124 {offsets = [0, 128], sizes = [2, 128], strides = [1, 1]} : vector<2x512xf32> to vector<2x128xf32>
    %132 = arith.negf %131 : vector<2x128xf32>
    %133 = math.exp %132 : vector<2x128xf32>
    %cst_29 = arith.constant 1.000000e+00 : f32
    %134 = vector.broadcast %cst_29 : f32 to vector<2x128xf32>
    %135 = arith.addf %134, %133 : vector<2x128xf32>
    %136 = arith.divf %134, %135 : vector<2x128xf32>
    %137 = vector.extract_strided_slice %124 {offsets = [0, 256], sizes = [2, 128], strides = [1, 1]} : vector<2x512xf32> to vector<2x128xf32>
    %138 = math.tanh %137 : vector<2x128xf32>
    %139 = vector.extract_strided_slice %124 {offsets = [0, 384], sizes = [2, 128], strides = [1, 1]} : vector<2x512xf32> to vector<2x128xf32>
    %140 = arith.negf %139 : vector<2x128xf32>
    %141 = math.exp %140 : vector<2x128xf32>
    %cst_30 = arith.constant 1.000000e+00 : f32
    %142 = vector.broadcast %cst_30 : f32 to vector<2x128xf32>
    %143 = arith.addf %142, %141 : vector<2x128xf32>
    %144 = arith.divf %142, %143 : vector<2x128xf32>
    %145 = arith.mulf %136, %119 : vector<2x128xf32>
    %146 = arith.mulf %130, %138 : vector<2x128xf32>
    %147 = arith.addf %145, %146 : vector<2x128xf32>
    %148 = math.tanh %147 : vector<2x128xf32>
    %149 = arith.mulf %144, %148 : vector<2x128xf32>
    %150 = vector.extract_strided_slice %5 {offsets = [10, 0], sizes = [2, 512], strides = [1, 1]} : vector<16x1024xf32> to vector<2x512xf32>
    %cst_31 = arith.constant dense<0.000000e+00> : vector<2x512xf32>
    %151 = tpu.matmul %149, %6, %cst_31 {dimension_numbers = #tpu.dot_dimension_numbers<[1], [0], [0], [1], [0, 0, 1, 1], [], []>} : vector<2x128xf32>, vector<128x512xf32>, vector<2x512xf32> -> vector<2x512xf32>
    %152 = arith.addf %150, %151 : vector<2x512xf32>
    %153 = vector.extract_strided_slice %152 {offsets = [0, 0], sizes = [2, 128], strides = [1, 1]} : vector<2x512xf32> to vector<2x128xf32>
    %154 = arith.negf %153 : vector<2x128xf32>
    %155 = math.exp %154 : vector<2x128xf32>
    %cst_32 = arith.constant 1.000000e+00 : f32
    %156 = vector.broadcast %cst_32 : f32 to vector<2x128xf32>
    %157 = arith.addf %156, %155 : vector<2x128xf32>
    %158 = arith.divf %156, %157 : vector<2x128xf32>
    %159 = vector.extract_strided_slice %152 {offsets = [0, 128], sizes = [2, 128], strides = [1, 1]} : vector<2x512xf32> to vector<2x128xf32>
    %160 = arith.negf %159 : vector<2x128xf32>
    %161 = math.exp %160 : vector<2x128xf32>
    %cst_33 = arith.constant 1.000000e+00 : f32
    %162 = vector.broadcast %cst_33 : f32 to vector<2x128xf32>
    %163 = arith.addf %162, %161 : vector<2x128xf32>
    %164 = arith.divf %162, %163 : vector<2x128xf32>
    %165 = vector.extract_strided_slice %152 {offsets = [0, 256], sizes = [2, 128], strides = [1, 1]} : vector<2x512xf32> to vector<2x128xf32>
    %166 = math.tanh %165 : vector<2x128xf32>
    %167 = vector.extract_strided_slice %152 {offsets = [0, 384], sizes = [2, 128], strides = [1, 1]} : vector<2x512xf32> to vector<2x128xf32>
    %168 = arith.negf %167 : vector<2x128xf32>
    %169 = math.exp %168 : vector<2x128xf32>
    %cst_34 = arith.constant 1.000000e+00 : f32
    %170 = vector.broadcast %cst_34 : f32 to vector<2x128xf32>
    %171 = arith.addf %170, %169 : vector<2x128xf32>
    %172 = arith.divf %170, %171 : vector<2x128xf32>
    %173 = arith.mulf %164, %147 : vector<2x128xf32>
    %174 = arith.mulf %158, %166 : vector<2x128xf32>
    %175 = arith.addf %173, %174 : vector<2x128xf32>
    %176 = math.tanh %175 : vector<2x128xf32>
    %177 = arith.mulf %172, %176 : vector<2x128xf32>
    %178 = vector.extract_strided_slice %5 {offsets = [12, 0], sizes = [2, 512], strides = [1, 1]} : vector<16x1024xf32> to vector<2x512xf32>
    %cst_35 = arith.constant dense<0.000000e+00> : vector<2x512xf32>
    %179 = tpu.matmul %177, %6, %cst_35 {dimension_numbers = #tpu.dot_dimension_numbers<[1], [0], [0], [1], [0, 0, 1, 1], [], []>} : vector<2x128xf32>, vector<128x512xf32>, vector<2x512xf32> -> vector<2x512xf32>
    %180 = arith.addf %178, %179 : vector<2x512xf32>
    %181 = vector.extract_strided_slice %180 {offsets = [0, 0], sizes = [2, 128], strides = [1, 1]} : vector<2x512xf32> to vector<2x128xf32>
    %182 = arith.negf %181 : vector<2x128xf32>
    %183 = math.exp %182 : vector<2x128xf32>
    %cst_36 = arith.constant 1.000000e+00 : f32
    %184 = vector.broadcast %cst_36 : f32 to vector<2x128xf32>
    %185 = arith.addf %184, %183 : vector<2x128xf32>
    %186 = arith.divf %184, %185 : vector<2x128xf32>
    %187 = vector.extract_strided_slice %180 {offsets = [0, 128], sizes = [2, 128], strides = [1, 1]} : vector<2x512xf32> to vector<2x128xf32>
    %188 = arith.negf %187 : vector<2x128xf32>
    %189 = math.exp %188 : vector<2x128xf32>
    %cst_37 = arith.constant 1.000000e+00 : f32
    %190 = vector.broadcast %cst_37 : f32 to vector<2x128xf32>
    %191 = arith.addf %190, %189 : vector<2x128xf32>
    %192 = arith.divf %190, %191 : vector<2x128xf32>
    %193 = vector.extract_strided_slice %180 {offsets = [0, 256], sizes = [2, 128], strides = [1, 1]} : vector<2x512xf32> to vector<2x128xf32>
    %194 = math.tanh %193 : vector<2x128xf32>
    %195 = vector.extract_strided_slice %180 {offsets = [0, 384], sizes = [2, 128], strides = [1, 1]} : vector<2x512xf32> to vector<2x128xf32>
    %196 = arith.negf %195 : vector<2x128xf32>
    %197 = math.exp %196 : vector<2x128xf32>
    %cst_38 = arith.constant 1.000000e+00 : f32
    %198 = vector.broadcast %cst_38 : f32 to vector<2x128xf32>
    %199 = arith.addf %198, %197 : vector<2x128xf32>
    %200 = arith.divf %198, %199 : vector<2x128xf32>
    %201 = arith.mulf %192, %175 : vector<2x128xf32>
    %202 = arith.mulf %186, %194 : vector<2x128xf32>
    %203 = arith.addf %201, %202 : vector<2x128xf32>
    %204 = math.tanh %203 : vector<2x128xf32>
    %205 = arith.mulf %200, %204 : vector<2x128xf32>
    %206 = vector.extract_strided_slice %5 {offsets = [14, 0], sizes = [2, 512], strides = [1, 1]} : vector<16x1024xf32> to vector<2x512xf32>
    %cst_39 = arith.constant dense<0.000000e+00> : vector<2x512xf32>
    %207 = tpu.matmul %205, %6, %cst_39 {dimension_numbers = #tpu.dot_dimension_numbers<[1], [0], [0], [1], [0, 0, 1, 1], [], []>} : vector<2x128xf32>, vector<128x512xf32>, vector<2x512xf32> -> vector<2x512xf32>
    %208 = arith.addf %206, %207 : vector<2x512xf32>
    %209 = vector.extract_strided_slice %208 {offsets = [0, 0], sizes = [2, 128], strides = [1, 1]} : vector<2x512xf32> to vector<2x128xf32>
    %210 = arith.negf %209 : vector<2x128xf32>
    %211 = math.exp %210 : vector<2x128xf32>
    %cst_40 = arith.constant 1.000000e+00 : f32
    %212 = vector.broadcast %cst_40 : f32 to vector<2x128xf32>
    %213 = arith.addf %212, %211 : vector<2x128xf32>
    %214 = arith.divf %212, %213 : vector<2x128xf32>
    %215 = vector.extract_strided_slice %208 {offsets = [0, 128], sizes = [2, 128], strides = [1, 1]} : vector<2x512xf32> to vector<2x128xf32>
    %216 = arith.negf %215 : vector<2x128xf32>
    %217 = math.exp %216 : vector<2x128xf32>
    %cst_41 = arith.constant 1.000000e+00 : f32
    %218 = vector.broadcast %cst_41 : f32 to vector<2x128xf32>
    %219 = arith.addf %218, %217 : vector<2x128xf32>
    %220 = arith.divf %218, %219 : vector<2x128xf32>
    %221 = vector.extract_strided_slice %208 {offsets = [0, 256], sizes = [2, 128], strides = [1, 1]} : vector<2x512xf32> to vector<2x128xf32>
    %222 = math.tanh %221 : vector<2x128xf32>
    %223 = vector.extract_strided_slice %208 {offsets = [0, 384], sizes = [2, 128], strides = [1, 1]} : vector<2x512xf32> to vector<2x128xf32>
    %224 = arith.negf %223 : vector<2x128xf32>
    %225 = math.exp %224 : vector<2x128xf32>
    %cst_42 = arith.constant 1.000000e+00 : f32
    %226 = vector.broadcast %cst_42 : f32 to vector<2x128xf32>
    %227 = arith.addf %226, %225 : vector<2x128xf32>
    %228 = arith.divf %226, %227 : vector<2x128xf32>
    %229 = arith.mulf %220, %203 : vector<2x128xf32>
    %230 = arith.mulf %214, %222 : vector<2x128xf32>
    %231 = arith.addf %229, %230 : vector<2x128xf32>
    %232 = math.tanh %231 : vector<2x128xf32>
    %233 = arith.mulf %228, %232 : vector<2x128xf32>
    %234 = vector.extract_strided_slice %5 {offsets = [14, 512], sizes = [2, 512], strides = [1, 1]} : vector<16x1024xf32> to vector<2x512xf32>
    %cst_43 = arith.constant 0.000000e+00 : f32
    %235 = vector.broadcast %cst_43 : f32 to vector<2x128xf32>
    %236 = vector.extract_strided_slice %234 {offsets = [0, 0], sizes = [2, 128], strides = [1, 1]} : vector<2x512xf32> to vector<2x128xf32>
    %237 = arith.negf %236 : vector<2x128xf32>
    %238 = math.exp %237 : vector<2x128xf32>
    %cst_44 = arith.constant 1.000000e+00 : f32
    %239 = vector.broadcast %cst_44 : f32 to vector<2x128xf32>
    %240 = arith.addf %239, %238 : vector<2x128xf32>
    %241 = arith.divf %239, %240 : vector<2x128xf32>
    %242 = vector.extract_strided_slice %234 {offsets = [0, 128], sizes = [2, 128], strides = [1, 1]} : vector<2x512xf32> to vector<2x128xf32>
    %243 = arith.negf %242 : vector<2x128xf32>
    %244 = math.exp %243 : vector<2x128xf32>
    %cst_45 = arith.constant 1.000000e+00 : f32
    %245 = vector.broadcast %cst_45 : f32 to vector<2x128xf32>
    %246 = arith.addf %245, %244 : vector<2x128xf32>
    %247 = arith.divf %245, %246 : vector<2x128xf32>
    %248 = vector.extract_strided_slice %234 {offsets = [0, 256], sizes = [2, 128], strides = [1, 1]} : vector<2x512xf32> to vector<2x128xf32>
    %249 = math.tanh %248 : vector<2x128xf32>
    %250 = vector.extract_strided_slice %234 {offsets = [0, 384], sizes = [2, 128], strides = [1, 1]} : vector<2x512xf32> to vector<2x128xf32>
    %251 = arith.negf %250 : vector<2x128xf32>
    %252 = math.exp %251 : vector<2x128xf32>
    %cst_46 = arith.constant 1.000000e+00 : f32
    %253 = vector.broadcast %cst_46 : f32 to vector<2x128xf32>
    %254 = arith.addf %253, %252 : vector<2x128xf32>
    %255 = arith.divf %253, %254 : vector<2x128xf32>
    %256 = arith.mulf %247, %235 : vector<2x128xf32>
    %257 = arith.mulf %241, %249 : vector<2x128xf32>
    %258 = arith.addf %256, %257 : vector<2x128xf32>
    %259 = math.tanh %258 : vector<2x128xf32>
    %260 = arith.mulf %255, %259 : vector<2x128xf32>
    %261 = vector.extract_strided_slice %7 {offsets = [0, 0], sizes = [128, 3], strides = [1, 1]} : vector<256x3xf32> to vector<128x3xf32>
    %cst_47 = arith.constant dense<0.000000e+00> : vector<2x3xf32>
    %262 = tpu.matmul %233, %261, %cst_47 {dimension_numbers = #tpu.dot_dimension_numbers<[1], [0], [0], [1], [0, 0, 1, 1], [], []>} : vector<2x128xf32>, vector<128x3xf32>, vector<2x3xf32> -> vector<2x3xf32>
    %263 = vector.extract_strided_slice %7 {offsets = [128, 0], sizes = [128, 3], strides = [1, 1]} : vector<256x3xf32> to vector<128x3xf32>
    %cst_48 = arith.constant dense<0.000000e+00> : vector<2x3xf32>
    %264 = tpu.matmul %260, %263, %cst_48 {dimension_numbers = #tpu.dot_dimension_numbers<[1], [0], [0], [1], [0, 0, 1, 1], [], []>} : vector<2x128xf32>, vector<128x3xf32>, vector<2x3xf32> -> vector<2x3xf32>
    %265 = arith.addf %262, %264 : vector<2x3xf32>
    %c0_49 = arith.constant 0 : index
    %c0_50 = arith.constant 0 : index
    %266 = vector.load %arg5[%c0_49, %c0_50] : memref<1x3xf32, #tpu.memory_space<vmem>>, vector<1x3xf32>
    %267 = vector.broadcast %266 : vector<1x3xf32> to vector<2x3xf32>
    %268 = arith.addf %265, %267 : vector<2x3xf32>
    %c0_51 = arith.constant 0 : index
    %c0_52 = arith.constant 0 : index
    %269 = vector.load %arg6[%c0_51, %c0_52] : memref<2x3xf32, #tpu.memory_space<vmem>>, vector<2x3xf32>
    tpu.vector_store %arg6[%c0_51, %c0_52], %268 {strides = array<i32>} : memref<2x3xf32, #tpu.memory_space<vmem>>, vector<2x3xf32>,
    return
  }
}

</mosaic_0001>

<bundles_post_ra>
// kernel: tpu_custom_call.1
= control target key start
LH: loop header
LB: loop body
LE: loop exit
PB: predicated region body
PF: predicated region fallthrough
CT: control target
= control target key end

     0   :  { %11 = vsyncpa [#allocation3], 0  ;;  %s3702_s0 = inlined_call_operand.vmem [shape: f32[16,7], index: 0, kind: input, shape index: {}]   ;;  %s3703_s1 = inlined_call_operand.vmem [shape: f32[7,1024], index: 1, kind: input, shape index: {}]   ;;  %s3704_s2 = inlined_call_operand.vmem [shape: f32[1,1024], index: 2, kind: input, shape index: {}]   ;;  %s3705_s3 = inlined_call_operand.hbm [shape: f32[128,512], index: 3, kind: input, shape index: {}]   ;;  %s3706_s4 = inlined_call_operand.vmem [shape: f32[256,3], index: 4, kind: input, shape index: {}]   ;;  %s3707_s5 = inlined_call_operand.vmem [shape: f32[1,3], index: 5, kind: input, shape index: {}]   ;;  %s3708_s6 = inlined_call_operand.hbm [shape: f32[2,3], index: 6, kind: output, shape index: {}]  }
   0x1   :  { %12 = vsyncpa [#allocation4], 0  ;;  %s2591_s21 = smov [#allocation2]  }
   0x2   :  { %s24_s22 = sshll.u32 %s2591_s21, 4  ;;  %s25_s22 = int_to_ptr.vmem [resolvable:$true] %s24_s22 }
   0x3   :  { %s2555_s23 = scalar_lea.vmem %s25_s22, 8192  ;;  %p2560_p1 = scmp.lt.s32.totalorder %s25_s22, %s25_s22 }
   0x4   :  { %p2556_p0 = scmp.ne.s32.totalorder %s25_s22, %s2555_s23  ;;  %p2561_p2 = scmp.lt.s32.totalorder %s2555_s23, %s2555_s23 }
   0x6   :  { %p2562_p3 = por %p2561_p2, %p2560_p1 }
   0x8   :  { %p2563_p4 = pnand %p2562_p3, %p2556_p0 }
   0xa   :  { %2566 = shalt.err (!%p2563_p4)
}
   0xb   :  { %s2592_s24 = smov 512   ;;  %s2593_s25 = smov 32  }
   0xc   :  { %30 = dma.hbm_to_vmem [thread:$0]  %s3705_s3, 8192, %s25_s22, [#allocation3], %s2592_s24, %s2592_s24, %s2593_s25  }
   0xd   :  { %2587 = dma.done.wait [#allocation3], 8192  }
   0xe   :  { %2588 = vsyncadd [#allocation3], 4294959104  ;;  %v3709_v0 = vmov 0.0   ;;  %vm97_vm0 = vcmask 1046528   ;;  %vm90_vm1 = vcmask 56320   ;;  %v38_v5 = vld [vmem:[%s3702_s0] sm:$0xff] }
   0xf   :  { %186 = vmatprep.mubr.f32.mxu0 %v3709_v0  ;;  %263 = vmatprep.mubr.f32.mxu1 %v3709_v0  ;;  %v41_v1 = vld [vmem:[%s3703_s1 + $0x8] sm:$0x7f]  ;;  %v43_v2 = vld [vmem:[%s3703_s1 + $0x18] sm:$0x7f]  ;;  %v40_v3 = vld [vmem:[%s3703_s1] sm:$0x7f] }
  0x10   :  { %2185 = vmatprep.subr.msk.mxu0 %vm97_vm0, %v41_v1  ;;  %2189 = vmatprep.subr.msk.mxu1 %vm97_vm0, %v43_v2  ;;  %v42_v4 = vld [vmem:[%s3703_s1 + $0x10] sm:$0x7f]  ;;  %v45_v6 = vld [vmem:[%s3703_s1 + $0x28] sm:$0x7f]  ;;  %v44_v7 = vld [vmem:[%s3703_s1 + $0x20] sm:$0x7f] }
  0x11   :  { %2186 = vmatpush1.msk.msra.mxu0 %vm97_vm0, %v40_v3  ;;  %2190 = vmatpush1.msk.msra.mxu1 %vm97_vm0, %v42_v4  ;;  %v47_v8 = vld [vmem:[%s3703_s1 + $0x38] sm:$0x7f]  ;;  %v2667_v9 = vld [vmem:[#allocation2 + $0x1e8] sm:$0xff]  ;;  %v46_v11 = vld [vmem:[%s3703_s1 + $0x30] sm:$0x7f]  ;;  %vm2595_vm2 = vmmov 0  }
  0x12   :  { %2187 = vmatmul.mubr.msk.f32.vlgmr.msra.gmra.mxu0 %vm90_vm1, %v38_v5  ;;  %2191 = vmatmul.mubr.msk.f32.vlgmr.msra.gmra.mxu1 %vm90_vm1, %v38_v5  ;;  %3819 = vst [vmem:[#allocation8_spill] sm:$0xff] %v2667_v9  ;;  %v2674_v10 = vld [vmem:[%s3702_s0 + $0x8] sm:$0xff]  ;;  %v2683_v12 = vld [vmem:[#allocation2 + $0x1f8] sm:$0xff]  ;;  %v2693_v13 = vld [vmem:[#allocation2 + $0x1e0] sm:$0xff]  ;;  %s2596_s7 = smov [#allocation5]   ;;  %vm2168_vm3 = vcmask 17408  }
  0x13   :  { %2193 = vmatprep.subr.msk.mxu0 %vm97_vm0, %v45_v6  ;;  %192 = vmatprep.mubr.f32.mxu0 %v3709_v0  ;;  %3820 = vst [vmem:[#allocation9_spill] sm:$0xff] %v2683_v12  ;;  %v2695_v14 = vld [vmem:[#allocation2 + $0x1f0] sm:$0xff]  ;;  %v2697_v15 = vld [vmem:[#allocation2 + $0x1c8] sm:$0xff]  ;;  %v2699_v16 = vld [vmem:[#allocation2 + $0x1d8] sm:$0xff]  ;;  %s2176_s8 = sshll.u32 %s2596_s7, 4  ;;  %s2177_s8 = int_to_ptr.vmem [resolvable:$true] %s2176_s8 }
  0x14   :  { %2194 = vmatpush1.msk.msra.mxu0 %vm97_vm0, %v44_v7  ;;  %269 = vmatprep.mubr.f32.mxu1 %v3709_v0  ;;  %v2703_v17 = vld [vmem:[#allocation2 + $0x1c0] sm:$0xff]  ;;  %v2705_v18 = vld [vmem:[#allocation2 + $0x1d0] sm:$0xff]  ;;  %v2709_v19 = vld [vmem:[#allocation2 + $0x1a8] sm:$0xff]  ;;  %s2567_s9 = scalar_lea.vmem %s2177_s8, 32  ;;  %p2572_p6 = scmp.lt.s32.totalorder %s2177_s8, %s2177_s8 }
  0x15   :  { %2197 = vmatprep.subr.msk.mxu1 %vm97_vm0, %v47_v8  ;;  %522 = vmatprep.subr.mxu0 %v2667_v9  ;;  %v2711_v20 = vld [vmem:[#allocation2 + $0x1b8] sm:$0xff]  ;;  %v2715_v21 = vld [vmem:[#allocation2 + $0x1a0] sm:$0xff]  ;;  %v2717_v22 = vld [vmem:[#allocation2 + $0x1b0] sm:$0xff]  ;;  %p2568_p5 = scmp.ne.s32.totalorder %s2177_s8, %s2567_s9  ;;  %p2573_p7 = scmp.lt.s32.totalorder %s2567_s9, %s2567_s9 }
  0x16   :  { %2188 = vmatmul.mubr.msk.f32.gmra.mxu0 %vm90_vm1, %v2674_v10  ;;  %2192 = vmatmul.mubr.msk.f32.gmra.mxu1 %vm90_vm1, %v2674_v10  ;;  %v2721_v23 = vld [vmem:[#allocation2 + $0x188] sm:$0xff]  ;;  %v2723_v24 = vld [vmem:[#allocation2 + $0x198] sm:$0xff]  ;;  %v2727_v25 = vld [vmem:[#allocation2 + $0x180] sm:$0xff] }
  0x17   :  { %2198 = vmatpush1.msk.msra.mxu1 %vm97_vm0, %v46_v11  ;;  %340 = vmatprep.mubr.f32.mxu0 %v3709_v0  ;;  %v2729_v26 = vld [vmem:[#allocation2 + $0x190] sm:$0xff]  ;;  %v2733_v27 = vld [vmem:[#allocation2 + $0x168] sm:$0xff]  ;;  %v2735_v28 = vld [vmem:[#allocation2 + $0x178] sm:$0xff]  ;;  %p2574_p8 = por %p2573_p7, %p2572_p6 }
  0x18   :  { %415 = vmatprep.mubr.f32.mxu1 %v3709_v0  ;;  %593 = vmatprep.subr.mxu1 %v2683_v12  ;;  %v2739_v29 = vld [vmem:[#allocation2 + $0x160] sm:$0xff]  ;;  %v2741_v30 = vld [vmem:[#allocation2 + $0x170] sm:$0xff]  ;;  %v2745_v31 = vld [vmem:[#allocation2 + $0x148] sm:$0xff] }
  0x19   :  { %v2747_v32 = vld [vmem:[#allocation2 + $0x158] sm:$0xff]  ;;  %v2751_v33 = vld [vmem:[#allocation2 + $0x140] sm:$0xff]  ;;  %v2753_v34 = vld [vmem:[#allocation2 + $0x150] sm:$0xff]  ;;  %p2575_p9 = pnand %p2574_p8, %p2568_p5 }
  0x1a   :  { %2195 = vmatmul.mubr.msk.f32.vlgmr.msra.gmra.mxu0 %vm90_vm1, %v38_v5  ;;  %2199 = vmatmul.mubr.msk.f32.vlgmr.msra.gmra.mxu1 %vm90_vm1, %v38_v5  ;;  %v2757_v35 = vld [vmem:[#allocation2 + $0x128] sm:$0xff]  ;;  %v2759_v36 = vld [vmem:[#allocation2 + $0x138] sm:$0xff]  ;;  %v2763_v37 = vld [vmem:[#allocation2 + $0x120] sm:$0xff] }
  0x1b   :  { %523 = vmatpush1.msra.mxu0 %v2693_v13  ;;  %594 = vmatpush1.msra.mxu1 %v2695_v14  ;;  %v2765_v38 = vld [vmem:[#allocation2 + $0x130] sm:$0xff]  ;;  %v2769_v39 = vld [vmem:[#allocation2 + $0x108] sm:$0xff]  ;;  %v2771_v40 = vld [vmem:[#allocation2 + $0x118] sm:$0xff] }
  0x1c   :  { %524 = vmatprep.subr.mxu0 %v2697_v15  ;;  %595 = vmatprep.subr.mxu1 %v2699_v16  ;;  %v2775_v41 = vld [vmem:[#allocation2 + $0x100] sm:$0xff]  ;;  %v2777_v42 = vld [vmem:[#allocation2 + $0x110] sm:$0xff]  ;;  %v2781_v43 = vld [vmem:[#allocation2 + $0xe8] sm:$0xff] }
  0x1d   :  { %525 = vmatpush1.msra.mxu0 %v2703_v17  ;;  %596 = vmatpush1.msra.mxu1 %v2705_v18  ;;  %v2783_v44 = vld [vmem:[#allocation2 + $0xf8] sm:$0xff]  ;;  %v2787_v45 = vld [vmem:[#allocation2 + $0xe0] sm:$0xff]  ;;  %v2789_v46 = vld [vmem:[#allocation2 + $0xf0] sm:$0xff] }
  0x1e   :  { %526 = vmatprep.subr.mxu0 %v2709_v19  ;;  %597 = vmatprep.subr.mxu1 %v2711_v20  ;;  %v2793_v47 = vld [vmem:[#allocation2 + $0xc8] sm:$0xff]  ;;  %v2795_v48 = vld [vmem:[#allocation2 + $0xd8] sm:$0xff]  ;;  %v2799_v49 = vld [vmem:[#allocation2 + $0xc0] sm:$0xff] }
  0x1f   :  { %527 = vmatpush1.msra.mxu0 %v2715_v21  ;;  %598 = vmatpush1.msra.mxu1 %v2717_v22  ;;  %3821 = vst [vmem:[#allocation10_spill] sm:$0xff] %v2795_v48  ;;  %3822 = vst [vmem:[#allocation11_spill] sm:$0xff] %v2799_v49  ;;  %v2801_v50 = vld [vmem:[#allocation2 + $0xd0] sm:$0xff]  ;;  %v2805_v51 = vld [vmem:[#allocation2 + $0xa8] sm:$0xff] }
  0x20   :  { %528 = vmatprep.subr.mxu0 %v2721_v23  ;;  %599 = vmatprep.subr.mxu1 %v2723_v24  ;;  %3823 = vst [vmem:[#allocation12_spill] sm:$0xff] %v2801_v50  ;;  %3824 = vst [vmem:[#allocation13_spill] sm:$0xff] %v2805_v51  ;;  %v2807_v52 = vld [vmem:[#allocation2 + $0xb8] sm:$0xff]  ;;  %v2811_v53 = vld [vmem:[#allocation2 + $0xa0] sm:$0xff] }
  0x21   :  { %529 = vmatpush1.msra.mxu0 %v2727_v25  ;;  %600 = vmatpush1.msra.mxu1 %v2729_v26  ;;  %3825 = vst [vmem:[#allocation14_spill] sm:$0xff] %v2807_v52  ;;  %3826 = vst [vmem:[#allocation15_spill] sm:$0xff] %v2811_v53  ;;  %v2813_v54 = vld [vmem:[#allocation2 + $0xb0] sm:$0xff]  ;;  %v2817_v55 = vld [vmem:[#allocation2 + $0x88] sm:$0xff] }
  0x22   :  { %530 = vmatprep.subr.mxu0 %v2733_v27  ;;  %601 = vmatprep.subr.mxu1 %v2735_v28  ;;  %3827 = vst [vmem:[#allocation16_spill] sm:$0xff] %v2813_v54  ;;  %3828 = vst [vmem:[#allocation17_spill] sm:$0xff] %v2817_v55  ;;  %v2819_v56 = vld [vmem:[#allocation2 + $0x98] sm:$0xff]  ;;  %v2823_v57 = vld [vmem:[#allocation2 + $0x80] sm:$0xff] }
  0x23   :  { %531 = vmatpush1.msra.mxu0 %v2739_v29  ;;  %602 = vmatpush1.msra.mxu1 %v2741_v30  ;;  %3829 = vst [vmem:[#allocation18_spill] sm:$0xff] %v2819_v56  ;;  %3830 = vst [vmem:[#allocation19_spill] sm:$0xff] %v2823_v57  ;;  %v2825_v58 = vld [vmem:[#allocation2 + $0x90] sm:$0xff]  ;;  %v2829_v59 = vld [vmem:[#allocation2 + $0x68] sm:$0xff] }
  0x24   :  { %532 = vmatprep.subr.mxu0 %v2745_v31  ;;  %603 = vmatprep.subr.mxu1 %v2747_v32  ;;  %3831 = vst [vmem:[#allocation20_spill] sm:$0xff] %v2825_v58  ;;  %3832 = vst [vmem:[#allocation21_spill] sm:$0xff] %v2829_v59  ;;  %v2831_v60 = vld [vmem:[#allocation2 + $0x78] sm:$0xff]  ;;  %v2835_v61 = vld [vmem:[#allocation2 + $0x60] sm:$0xff] }
  0x25   :  { %533 = vmatpush1.msra.mxu0 %v2751_v33  ;;  %604 = vmatpush1.msra.mxu1 %v2753_v34  ;;  %3833 = vst [vmem:[#allocation22_spill] sm:$0xff] %v2831_v60  ;;  %3834 = vst [vmem:[#allocation23_spill] sm:$0xff] %v2835_v61  ;;  %v2837_v62 = vld [vmem:[#allocation2 + $0x70] sm:$0xff]  ;;  %v2841_v63 = vld [vmem:[#allocation2 + $0x48] sm:$0xff] }
  0x26   :  { %534 = vmatprep.subr.mxu0 %v2757_v35  ;;  %605 = vmatprep.subr.mxu1 %v2759_v36  ;;  %3835 = vst [vmem:[#allocation24_spill] sm:$0xff] %v2837_v62  ;;  %3836 = vst [vmem:[#allocation25_spill] sm:$0xff] %v2841_v63  ;;  %v2845_v1 = vld [vmem:[#allocation2 + $0x58] sm:$0xff]  ;;  %v2849_v2 = vld [vmem:[#allocation2 + $0x40] sm:$0xff] }
  0x27   :  { %535 = vmatpush1.msra.mxu0 %v2763_v37  ;;  %606 = vmatpush1.msra.mxu1 %v2765_v38  ;;  %3837 = vst [vmem:[#allocation26_spill] sm:$0xff] %v2845_v1  ;;  %3838 = vst [vmem:[#allocation27_spill] sm:$0xff] %v2849_v2  ;;  %v2853_v3 = vld [vmem:[#allocation2 + $0x50] sm:$0xff]  ;;  %v2855_v4 = vld [vmem:[#allocation2 + $0x28] sm:$0xff] }
  0x28   :  { %536 = vmatprep.subr.mxu0 %v2769_v39  ;;  %607 = vmatprep.subr.mxu1 %v2771_v40  ;;  %3839 = vst [vmem:[#allocation28_spill] sm:$0xff] %v2853_v3  ;;  %3840 = vst [vmem:[#allocation29_spill] sm:$0xff] %v2855_v4  ;;  %v2860_v5 = vld [vmem:[#allocation2 + $0x38] sm:$0xff]  ;;  %v2864_v6 = vld [vmem:[#allocation2 + $0x20] sm:$0xff] }
  0x29   :  { %537 = vmatpush1.msra.mxu0 %v2775_v41  ;;  %608 = vmatpush1.msra.mxu1 %v2777_v42  ;;  %3841 = vst [vmem:[#allocation30_spill] sm:$0xff] %v2860_v5  ;;  %3842 = vst [vmem:[#allocation31_spill] sm:$0xff] %v2864_v6  ;;  %v2866_v7 = vld [vmem:[#allocation2 + $0x30] sm:$0xff]  ;;  %v2870_v8 = vld [vmem:[#allocation2 + $0x8] sm:$0xff] }
  0x2a   :  { %538 = vmatprep.subr.mxu0 %v2781_v43  ;;  %609 = vmatprep.subr.mxu1 %v2783_v44  ;;  %3843 = vst [vmem:[#allocation32_spill] sm:$0xff] %v2866_v7  ;;  %3844 = vst [vmem:[#allocation33_spill] sm:$0xff] %v2870_v8  ;;  %v2872_v11 = vld [vmem:[#allocation2 + $0x18] sm:$0xff] }
  0x2b   :  { %539 = vmatpush1.msra.mxu0 %v2787_v45  ;;  %610 = vmatpush1.msra.mxu1 %v2789_v46  ;;  %3845 = vst [vmem:[#allocation34_spill] sm:$0xff] %v2872_v11 }
  0x2c   :  { %540 = vmatprep.subr.mxu0 %v2793_v47  ;;  %611 = vmatprep.subr.mxu1 %v2795_v48 }
  0x2d   :  { %541 = vmatpush1.msra.mxu0 %v2799_v49  ;;  %612 = vmatpush1.msra.mxu1 %v2801_v50 }
  0x2e   :  { %542 = vmatprep.subr.mxu0 %v2805_v51  ;;  %613 = vmatprep.subr.mxu1 %v2807_v52 }
  0x2f   :  { %543 = vmatpush1.msra.mxu0 %v2811_v53  ;;  %614 = vmatpush1.msra.mxu1 %v2813_v54 }
  0x30   :  { %544 = vmatprep.subr.mxu0 %v2817_v55  ;;  %615 = vmatprep.subr.mxu1 %v2819_v56 }
  0x31   :  { %545 = vmatpush1.msra.mxu0 %v2823_v57  ;;  %616 = vmatpush1.msra.mxu1 %v2825_v58 }
  0x32   :  { %546 = vmatprep.subr.mxu0 %v2829_v59  ;;  %617 = vmatprep.subr.mxu1 %v2831_v60 }
  0x33   :  { %547 = vmatpush1.msra.mxu0 %v2835_v61  ;;  %618 = vmatpush1.msra.mxu1 %v2837_v62 }
  0x34   :  { %344 = vmatprep.mubr.f32.mxu0 %v3709_v0  ;;  %548 = vmatprep.subr.mxu0 %v2841_v63 }
  0x35   :  { %619 = vmatprep.subr.mxu1 %v2845_v1  ;;  %2196 = vmatmul.mubr.msk.f32.gmra.mxu0 %vm90_vm1, %v2674_v10 }
  0x36   :  { %419 = vmatprep.mubr.f32.mxu1 %v3709_v0  ;;  %549 = vmatpush1.msra.mxu0 %v2849_v2  ;;  %v2877_v0 = vld [vmem:[#allocation2] sm:$0xff]  ;;  %v2881_v2 = vld [vmem:[#allocation2 + $0x10] sm:$0xff] }
  0x37   :  { %620 = vmatpush1.msra.mxu1 %v2853_v3  ;;  %550 = vmatprep.subr.mxu0 %v2855_v4  ;;  %3846 = vst [vmem:[#allocation35_spill] sm:$0xff] %v2877_v0  ;;  %3847 = vst [vmem:[#allocation36_spill] sm:$0xff] %v2881_v2  ;;  %v3848_v4 = vmov 0.0  }
  0x38   :  { %2200 = vmatmul.mubr.msk.f32.gmra.mxu1 %vm90_vm1, %v2674_v10  ;;  %621 = vmatprep.subr.mxu1 %v2860_v5  ;;  %v3849_v10 = vld [vmem:[#allocation27_spill] sm:$0xff] }
  0x39   :  { %551 = vmatpush1.msra.mxu0 %v2864_v6  ;;  %622 = vmatpush1.msra.mxu1 %v2866_v7 }
  0x3a   :  { %552 = vmatprep.subr.mxu0 %v2870_v8  ;;  %623 = vmatprep.subr.mxu1 %v2872_v11 }
  0x3b   :  { %553 = vmatpush1.msra.mxu0 %v2877_v0  ;;  %586 = vmatprep.mubr.f32.mxu0 %v3848_v4 }
  0x3c   :  { %624 = vmatpush1.msra.mxu1 %v2881_v2  ;;  %657 = vmatprep.mubr.f32.mxu1 %v3848_v4 }
  0x3d   :  { %587 = vmatmul.mubr.f32.vlgmr.msra.gmra.mxu0 %v3848_v4  ;;  %658 = vmatmul.mubr.f32.vlgmr.msra.gmra.mxu1 %v3848_v4 }
  0x3e   :  { %692 = vmatprep.subr.mxu0 %v2667_v9  ;;  %763 = vmatprep.subr.mxu1 %v2683_v12 }
  0x3f   :  { %693 = vmatpush1.msra.mxu0 %v2693_v13  ;;  %764 = vmatpush1.msra.mxu1 %v2695_v14 }
  0x40   :  { %694 = vmatprep.subr.mxu0 %v2697_v15  ;;  %765 = vmatprep.subr.mxu1 %v2699_v16 }
  0x41   :  { %695 = vmatpush1.msra.mxu0 %v2703_v17  ;;  %766 = vmatpush1.msra.mxu1 %v2705_v18 }
  0x42   :  { %696 = vmatprep.subr.mxu0 %v2709_v19  ;;  %767 = vmatprep.subr.mxu1 %v2711_v20 }
  0x43   :  { %697 = vmatpush1.msra.mxu0 %v2715_v21  ;;  %768 = vmatpush1.msra.mxu1 %v2717_v22 }
  0x44   :  { %698 = vmatprep.subr.mxu0 %v2721_v23  ;;  %769 = vmatprep.subr.mxu1 %v2723_v24 }
  0x45   :  { %699 = vmatpush1.msra.mxu0 %v2727_v25  ;;  %770 = vmatpush1.msra.mxu1 %v2729_v26 }
  0x46   :  { %700 = vmatprep.subr.mxu0 %v2733_v27  ;;  %771 = vmatprep.subr.mxu1 %v2735_v28 }
  0x47   :  { %701 = vmatpush1.msra.mxu0 %v2739_v29  ;;  %772 = vmatpush1.msra.mxu1 %v2741_v30 }
  0x48   :  { %702 = vmatprep.subr.mxu0 %v2745_v31  ;;  %773 = vmatprep.subr.mxu1 %v2747_v32 }
  0x49   :  { %703 = vmatpush1.msra.mxu0 %v2751_v33  ;;  %774 = vmatpush1.msra.mxu1 %v2753_v34 }
  0x4a   :  { %704 = vmatprep.subr.mxu0 %v2757_v35  ;;  %775 = vmatprep.subr.mxu1 %v2759_v36 }
  0x4b   :  { %705 = vmatpush1.msra.mxu0 %v2763_v37  ;;  %776 = vmatpush1.msra.mxu1 %v2765_v38 }
  0x4c   :  { %706 = vmatprep.subr.mxu0 %v2769_v39  ;;  %777 = vmatprep.subr.mxu1 %v2771_v40 }
  0x4d   :  { %707 = vmatpush1.msra.mxu0 %v2775_v41  ;;  %778 = vmatpush1.msra.mxu1 %v2777_v42 }
  0x4e   :  { %708 = vmatprep.subr.mxu0 %v2781_v43  ;;  %779 = vmatprep.subr.mxu1 %v2783_v44 }
  0x4f   :  { %709 = vmatpush1.msra.mxu0 %v2787_v45  ;;  %780 = vmatpush1.msra.mxu1 %v2789_v46 }
  0x50   :  { %710 = vmatprep.subr.mxu0 %v2793_v47  ;;  %781 = vmatprep.subr.mxu1 %v2795_v48 }
  0x51   :  { %711 = vmatpush1.msra.mxu0 %v2799_v49  ;;  %782 = vmatpush1.msra.mxu1 %v2801_v50 }
  0x52   :  { %712 = vmatprep.subr.mxu0 %v2805_v51  ;;  %783 = vmatprep.subr.mxu1 %v2807_v52 }
  0x53   :  { %713 = vmatpush1.msra.mxu0 %v2811_v53  ;;  %784 = vmatpush1.msra.mxu1 %v2813_v54 }
  0x54   :  { %714 = vmatprep.subr.mxu0 %v2817_v55  ;;  %785 = vmatprep.subr.mxu1 %v2819_v56  ;;  %v3850_v56 = vld [vmem:[#allocation29_spill] sm:$0xff] }
  0x55   :  { %715 = vmatpush1.msra.mxu0 %v2823_v57  ;;  %786 = vmatpush1.msra.mxu1 %v2825_v58 }
  0x56   :  { %716 = vmatprep.subr.mxu0 %v2829_v59  ;;  %787 = vmatprep.subr.mxu1 %v2831_v60 }
  0x57   :  { %717 = vmatpush1.msra.mxu0 %v2835_v61  ;;  %788 = vmatpush1.msra.mxu1 %v2837_v62 }
  0x58   :  { %718 = vmatprep.subr.mxu0 %v2841_v63  ;;  %789 = vmatprep.subr.mxu1 %v2845_v1 }
  0x59   :  { %719 = vmatpush1.msra.mxu0 %v3849_v10  ;;  %790 = vmatpush1.msra.mxu1 %v2853_v3 }
  0x5a   :  { %720 = vmatprep.subr.mxu0 %v3850_v56  ;;  %791 = vmatprep.subr.mxu1 %v2860_v5  ;;  %v50_v5 = vlaneseq }
  0x5b   :  { %721 = vmatpush1.msra.mxu0 %v2864_v6  ;;  %792 = vmatpush1.msra.mxu1 %v2866_v7 }
  0x5c   :  { %722 = vmatprep.subr.mxu0 %v2870_v8  ;;  %793 = vmatprep.subr.mxu1 %v2872_v11  ;;  %v51_v6 = vshrl.u32 %v50_v5, 7  ;;  %v48_v11 = vld [vmem:[%s3704_s2] sm:$0xff] }
  0x5d   :  { %723 = vmatpush1.msra.mxu0 %v2877_v0  ;;  %756 = vmatprep.mubr.f32.mxu0 %v3848_v4 }
  0x5e   :  { %794 = vmatpush1.msra.mxu1 %v2881_v2  ;;  %827 = vmatprep.mubr.f32.mxu1 %v3848_v4  ;;  %v52_v56 = vsub.s32 0, %v51_v6  ;;  %v60_v7 = vsub.s32 2, %v51_v6  ;;  %v56_v3 = vsub.s32 1, %v51_v6  ;;  %v64_v10 = vsub.s32 3, %v51_v6 }
  0x5f   :  { %880 = vmatprep.subr.mxu0 %v2667_v9  ;;  %951 = vmatprep.subr.mxu1 %v2683_v12 }
  0x60   :  { %v53_v4 = vrot.slane %v48_v11, %v52_v56  ;;  %v61_v63 = vrot.slane %v48_v11, %v60_v7  ;;  %v57_v12 = vrot.slane %v48_v11, %v56_v3  ;;  %v65_v5 = vrot.slane %v48_v11, %v64_v10 }
  0x61   :  { %v68_v56 = vsub.s32 4, %v51_v6  ;;  %v72_v7 = vsub.s32 5, %v51_v6 }
  0x63   :  { %v69_v50 = vrot.slane %v48_v11, %v68_v56  ;;  %v73_v49 = vrot.slane %v48_v11, %v72_v7 }
  0xd2   :  { %v188_v8 = vpop.f32.mrf.mxu0  ;;  %v2962_v0 = vpop.f32.mrf.mxu1 }
  0xd4   :  { %v190_v2 = vpop.f32.mrf.mxu0  ;;  %v267_v1 = vpop.f32.mrf.mxu1 }
  0xd6   :  { %v194_v9 = vpop.f32.mrf.mxu0  ;;  %v271_v62 = vpop.f32.mrf.mxu1 }
  0xd7   :  { %v2964_v61 = vadd.f32 %v194_v9, %v53_v4  ;;  %v2966_v60 = vadd.f32 %v271_v62, %v61_v63 }
  0xd8   :  { %v196_v59 = vpop.f32.mrf.mxu0  ;;  %v273_v58 = vpop.f32.mrf.mxu1 }
  0xd9   :  { %3851 = vst [vmem:[#allocation37_spill] sm:$0xff] %v2964_v61  ;;  %3852 = vst [vmem:[#allocation38_spill] sm:$0xff] %v2966_v60  ;;  %v2968_v57 = vadd.f32 %v196_v59, %v57_v12  ;;  %v2970_v55 = vadd.f32 %v273_v58, %v65_v5  ;;  %v80_v60 = vsub.s32 7, %v51_v6  ;;  %v2972_v58 = vadd.f32 %v188_v8, %v53_v4 }
  0xda   :  { %v342_v54 = vpop.f32.mrf.mxu0  ;;  %v417_v53 = vpop.f32.mrf.mxu1 }
  0xdb   :  { %3853 = vst [vmem:[#allocation39_spill] sm:$0xff] %v2968_v57  ;;  %3854 = vst [vmem:[#allocation40_spill] sm:$0xff] %v2970_v55  ;;  %v76_v57 = vsub.s32 6, %v51_v6  ;;  %v81_v53 = vrot.slane %v48_v11, %v80_v60  ;;  %v3879_v55 = vld [vmem:[#allocation33_spill] sm:$0xff] }
  0xdc   :  { %v343_v52 = vpop.f32.mrf.mxu0  ;;  %v418_v51 = vpop.f32.mrf.mxu1 }
  0xdd   :  { %v2974_v51 = vadd.f32 %v190_v2, %v57_v12  ;;  %v77_v7 = vrot.slane %v48_v11, %v76_v57 }
  0xf5   :  { %v346_v3 = vpop.f32.mrf.mxu0 }
  0xf6   :  { %v347_v9 = vadd.f32 %v346_v3, %v69_v50 }
  0xf7   :  { %v348_v61 = vpop.f32.mrf.mxu0 }
  0xf8   :  { %v2225_v10 = vmul.f32 -1.442695, %v347_v9  ;;  %v349_v62 = vadd.f32 %v348_v61, %v73_v49  ;;  %v421_v48 = vpop.f32.mrf.mxu1 }
  0xf9   :  { %v422_v6 = vadd.f32 %v421_v48, %v77_v7 }
  0xfa   :  { %2339 = vpow2.f32 %v2225_v10  ;;  %v2226_v59 = vmul.f32 -1.442695, %v349_v62  ;;  %v423_v54 = vpop.f32.mrf.mxu1  ;;  %v2978_v62 = vadd.f32 %v267_v1, %v65_v5 }
  0xfb   :  { %v424_v3 = vadd.f32 %v423_v54, %v81_v53 }
  0xfc   :  { %2341 = vpow2.f32 %v2226_v59  ;;  %v2982_v59 = vadd.f32 %v2962_v0, %v61_v63 }
  0xfd   :  { %v588_v52 = vpop.f32.mrf.mxu0  ;;  %v659_v61 = vpop.f32.mrf.mxu1  ;;  %v2227_v4 = vmul.f32 -1.442695, %v424_v3 }
  0xfe   :  { %v664_v56 = vadd.f32 %v588_v52, %v2972_v58  ;;  %v666_v52 = vadd.f32 %v659_v61, %v2982_v59 }
  0xff   :  { %v590_v50 = vpop.f32.mrf.mxu0  ;;  %v661_v8 = vpop.f32.mrf.mxu1 }
 0x100   :  { %v2201_v9 = vmul.f32 -1.442695, %v664_v56  ;;  %v665_v49 = vadd.f32 %v590_v50, %v2974_v51  ;;  %v667_v57 = vadd.f32 %v661_v8, %v2978_v62 }
 0x102   :  { %2343 = vpow2.f32 %v2201_v9  ;;  %v2202_v10 = vmul.f32 -1.442695, %v665_v49  ;;  %v2203_v53 = vmul.f32 -1.442695, %v667_v57 }
 0x104   :  { %2345 = vpow2.f32 %v2202_v10 }
 0x105   :  { %2347 = vtanh.f32 %v422_v6 }
 0x106   :  { %2349 = vpow2.f32 %v2227_v4 }
 0x107   :  { %v2340_v60 = vpop.eup %2339 }
 0x108   :  { %v1993_v12 = vadd.f32 1.0, %v2340_v60 }
 0x109   :  { %v2342_v2 = vpop.eup %2341 }
 0x10a   :  { %2351 = vrcp.f32 %v1993_v12  ;;  %v1999_v11 = vadd.f32 1.0, %v2342_v2 }
 0x10c   :  { %2353 = vrcp.f32 %v1999_v11 }
 0x10d   :  { %2355 = vpow2.f32 %v2203_v53 }
 0x10f   :  { %v2344_v48 = vpop.eup %2343 }
 0x110   :  { %v671_v54 = vadd.f32 1.0, %v2344_v48 }
 0x111   :  { %v2346_v56 = vpop.eup %2345 }
 0x112   :  { %2357 = vrcp.f32 %v671_v54  ;;  %v677_v1 = vadd.f32 1.0, %v2346_v56  ;;  %v2348_v5 = vpop.eup %2347  ;;  %v3856_v56 = vld [vmem:[#allocation10_spill] sm:$0xff] }
 0x113   :  { %2359 = vtanh.f32 %v666_v52  ;;  %v2350_v7 = vpop.eup %2349 }
 0x114   :  { %2361 = vrcp.f32 %v677_v1  ;;  %v2006_v9 = vadd.f32 1.0, %v2350_v7  ;;  %v3857_v1 = vld [vmem:[#allocation11_spill] sm:$0xff]  ;;  %v3859_v7 = vld [vmem:[#allocation13_spill] sm:$0xff] }
 0x116   :  { %2363 = vrcp.f32 %v2006_v9  ;;  %v3862_v9 = vld [vmem:[#allocation16_spill] sm:$0xff] }
 0x117   :  { %v2352_v50 = vpop.eup %2351 }
 0x118   :  { %v2010_v3 = vmul.f32 %v2352_v50, %v2348_v5  ;;  %v3858_v5 = vld [vmem:[#allocation12_spill] sm:$0xff]  ;;  %v3860_v50 = vld [vmem:[#allocation14_spill] sm:$0xff] }
 0x119   :  { %v2354_v49 = vpop.eup %2353 }
 0x11a   :  { %v2009_v10 = vmul.f32 0.0, %v2354_v49  ;;  %v2356_v63 = vpop.eup %2355  ;;  %v3863_v49 = vld [vmem:[#allocation17_spill] sm:$0xff] }
 0x11b   :  { %v684_v8 = vadd.f32 1.0, %v2356_v63  ;;  %v3866_v63 = vld [vmem:[#allocation20_spill] sm:$0xff] }
 0x11c   :  { %v2011_v0 = vadd.f32 %v2010_v3, %v2009_v10  ;;  %v3861_v3 = vld [vmem:[#allocation15_spill] sm:$0xff]  ;;  %v3864_v10 = vld [vmem:[#allocation18_spill] sm:$0xff] }
 0x11e   :  { %2365 = vtanh.f32 %v2011_v0  ;;  %v3865_v0 = vld [vmem:[#allocation19_spill] sm:$0xff] }
 0x11f   :  { %v2358_v6 = vpop.eup %2357  ;;  %2367 = vrcp.f32 %v684_v8  ;;  %v3870_v8 = vld [vmem:[#allocation24_spill] sm:$0xff] }
 0x120   :  { %v2360_v61 = vpop.eup %2359 }
 0x121   :  { %v2362_v4 = vpop.eup %2361  ;;  %v688_v12 = vmul.f32 %v2360_v61, %v2358_v6  ;;  %v3867_v6 = vld [vmem:[#allocation21_spill] sm:$0xff]  ;;  %v3868_v61 = vld [vmem:[#allocation22_spill] sm:$0xff] }
 0x122   :  { %v687_v60 = vmul.f32 0.0, %v2362_v4  ;;  %v3869_v4 = vld [vmem:[#allocation23_spill] sm:$0xff] }
 0x123   :  { %v2364_v57 = vpop.eup %2363 }
 0x124   :  { %v2985_v2 = vadd.f32 %v688_v12, %v687_v60  ;;  %v3871_v60 = vld [vmem:[#allocation25_spill] sm:$0xff]  ;;  %v3872_v12 = vld [vmem:[#allocation26_spill] sm:$0xff] }
 0x126   :  { %2369 = vtanh.f32 %v2985_v2 }
 0x12b   :  { %v2366_v11 = vpop.eup %2365 }
 0x12c   :  { %v2988_v53 = vmul.f32 %v2366_v11, %v2364_v57  ;;  %v2368_v48 = vpop.eup %2367  ;;  %v3873_v57 = vld [vmem:[#allocation27_spill] sm:$0xff]  ;;  %v3874_v11 = vld [vmem:[#allocation28_spill] sm:$0xff] }
 0x12e   :  { %3855 = vst [vmem:[#allocation41_spill] sm:$0xff] %v2988_v53  ;;  %v3878_v53 = vld [vmem:[#allocation32_spill] sm:$0xff] }
 0x133   :  { %v2370_v52 = vpop.eup %2369 }
 0x134   :  { %v691_v54 = vmul.f32 %v2370_v52, %v2368_v48  ;;  %v3875_v48 = vld [vmem:[#allocation29_spill] sm:$0xff]  ;;  %v3876_v52 = vld [vmem:[#allocation30_spill] sm:$0xff] }
 0x136   :  { %757 = vmatmul.mubr.f32.vlgmr.msra.gmra.mxu0 %v691_v54  ;;  %828 = vmatmul.mubr.f32.vlgmr.msra.gmra.mxu1 %v691_v54  ;;  %v3877_v54 = vld [vmem:[#allocation31_spill] sm:$0xff] }
 0x137   :  { %881 = vmatpush1.msra.mxu0 %v2693_v13  ;;  %952 = vmatpush1.msra.mxu1 %v2695_v14 }
 0x138   :  { %882 = vmatprep.subr.mxu0 %v2697_v15  ;;  %953 = vmatprep.subr.mxu1 %v2699_v16 }
 0x139   :  { %883 = vmatpush1.msra.mxu0 %v2703_v17  ;;  %954 = vmatpush1.msra.mxu1 %v2705_v18 }
 0x13a   :  { %884 = vmatprep.subr.mxu0 %v2709_v19  ;;  %955 = vmatprep.subr.mxu1 %v2711_v20 }
 0x13b   :  { %885 = vmatpush1.msra.mxu0 %v2715_v21  ;;  %956 = vmatpush1.msra.mxu1 %v2717_v22 }
 0x13c   :  { %886 = vmatprep.subr.mxu0 %v2721_v23  ;;  %957 = vmatprep.subr.mxu1 %v2723_v24 }
 0x13d   :  { %887 = vmatpush1.msra.mxu0 %v2727_v25  ;;  %958 = vmatpush1.msra.mxu1 %v2729_v26 }
 0x13e   :  { %888 = vmatprep.subr.mxu0 %v2733_v27  ;;  %959 = vmatprep.subr.mxu1 %v2735_v28 }
 0x13f   :  { %889 = vmatpush1.msra.mxu0 %v2739_v29  ;;  %960 = vmatpush1.msra.mxu1 %v2741_v30 }
 0x140   :  { %890 = vmatprep.subr.mxu0 %v2745_v31  ;;  %961 = vmatprep.subr.mxu1 %v2747_v32 }
 0x141   :  { %891 = vmatpush1.msra.mxu0 %v2751_v33  ;;  %962 = vmatpush1.msra.mxu1 %v2753_v34 }
 0x142   :  { %892 = vmatprep.subr.mxu0 %v2757_v35  ;;  %963 = vmatprep.subr.mxu1 %v2759_v36 }
 0x143   :  { %893 = vmatpush1.msra.mxu0 %v2763_v37  ;;  %964 = vmatpush1.msra.mxu1 %v2765_v38 }
 0x144   :  { %894 = vmatprep.subr.mxu0 %v2769_v39  ;;  %965 = vmatprep.subr.mxu1 %v2771_v40 }
 0x145   :  { %895 = vmatpush1.msra.mxu0 %v2775_v41  ;;  %966 = vmatpush1.msra.mxu1 %v2777_v42 }
 0x146   :  { %896 = vmatprep.subr.mxu0 %v2781_v43  ;;  %967 = vmatprep.subr.mxu1 %v2783_v44 }
 0x147   :  { %897 = vmatpush1.msra.mxu0 %v2787_v45  ;;  %968 = vmatpush1.msra.mxu1 %v2789_v46 }
 0x148   :  { %898 = vmatprep.subr.mxu0 %v2793_v47  ;;  %969 = vmatprep.subr.mxu1 %v3856_v56 }
 0x149   :  { %899 = vmatpush1.msra.mxu0 %v3857_v1  ;;  %970 = vmatpush1.msra.mxu1 %v3858_v5 }
 0x14a   :  { %900 = vmatprep.subr.mxu0 %v3859_v7  ;;  %971 = vmatprep.subr.mxu1 %v3860_v50 }
 0x14b   :  { %901 = vmatpush1.msra.mxu0 %v3861_v3  ;;  %972 = vmatpush1.msra.mxu1 %v3862_v9 }
 0x14c   :  { %902 = vmatprep.subr.mxu0 %v3863_v49  ;;  %973 = vmatprep.subr.mxu1 %v3864_v10 }
 0x14d   :  { %903 = vmatpush1.msra.mxu0 %v3865_v0  ;;  %974 = vmatpush1.msra.mxu1 %v3866_v63 }
 0x14e   :  { %904 = vmatprep.subr.mxu0 %v3867_v6  ;;  %975 = vmatprep.subr.mxu1 %v3868_v61 }
 0x14f   :  { %905 = vmatpush1.msra.mxu0 %v3869_v4  ;;  %976 = vmatpush1.msra.mxu1 %v3870_v8  ;;  %v3880_v4 = vld [vmem:[#allocation34_spill] sm:$0xff]  ;;  %v3881_v8 = vld [vmem:[#allocation35_spill] sm:$0xff] }
 0x150   :  { %906 = vmatprep.subr.mxu0 %v3871_v60  ;;  %977 = vmatprep.subr.mxu1 %v3872_v12  ;;  %v3882_v60 = vmov 0.0   ;;  %v3883_v12 = vld [vmem:[#allocation36_spill] sm:$0xff] }
 0x151   :  { %907 = vmatpush1.msra.mxu0 %v3873_v57  ;;  %978 = vmatpush1.msra.mxu1 %v3874_v11  ;;  %v3884_v11 = vld [vmem:[#allocation8_spill] sm:$0xff] }
 0x152   :  { %908 = vmatprep.subr.mxu0 %v3875_v48  ;;  %979 = vmatprep.subr.mxu1 %v3876_v52  ;;  %v3885_v48 = vld [vmem:[#allocation9_spill] sm:$0xff] }
 0x153   :  { %909 = vmatpush1.msra.mxu0 %v3877_v54  ;;  %980 = vmatpush1.msra.mxu1 %v3878_v53 }
 0x154   :  { %910 = vmatprep.subr.mxu0 %v3879_v55  ;;  %981 = vmatprep.subr.mxu1 %v3880_v4 }
 0x155   :  { %911 = vmatpush1.msra.mxu0 %v3881_v8  ;;  %944 = vmatprep.mubr.f32.mxu0 %v3882_v60 }
 0x156   :  { %982 = vmatpush1.msra.mxu1 %v3883_v12  ;;  %1015 = vmatprep.mubr.f32.mxu1 %v3882_v60 }
 0x157   :  { %1068 = vmatprep.subr.mxu0 %v3884_v11  ;;  %1139 = vmatprep.subr.mxu1 %v3885_v48 }
 0x1f6   :  { %v758_v52 = vpop.f32.mrf.mxu0  ;;  %v829_v55 = vpop.f32.mrf.mxu1 }
 0x1f7   :  { %v838_v54 = vrot.slane %v758_v52, 6  ;;  %v840_v11 = vrot.slane %v829_v55, 6 }
 0x1f8   :  { %v760_v57 = vpop.f32.mrf.mxu0  ;;  %v831_v63 = vpop.f32.mrf.mxu1 }
 0x1f9   :  { %v846_v53 = vadd.f32 %v838_v54, %v2972_v58  ;;  %v839_v61 = vrot.slane %v760_v57, 6  ;;  %v841_v12 = vrot.slane %v831_v63, 6  ;;  %v848_v52 = vadd.f32 %v840_v11, %v2982_v59  ;;  %v3906_v54 = vld [vmem:[#allocation36_spill] sm:$0xff] }
 0x1fb   :  { %v2204_v4 = vmul.f32 -1.442695, %v846_v53  ;;  %v847_v8 = vadd.f32 %v839_v61, %v2974_v51  ;;  %v849_v60 = vadd.f32 %v841_v12, %v2978_v62 }
 0x1fd   :  { %2371 = vpow2.f32 %v2204_v4  ;;  %v2205_v6 = vmul.f32 -1.442695, %v847_v8  ;;  %v2206_v0 = vmul.f32 -1.442695, %v849_v60 }
 0x1ff   :  { %2373 = vpow2.f32 %v2205_v6  ;;  %v870_v6 = vrot.slane %v2985_v2, 6  ;;  %v3904_v2 = vld [vmem:[#allocation35_spill] sm:$0xff] }
 0x200   :  { %2375 = vpow2.f32 %v2206_v0 }
 0x20a   :  { %v2372_v48 = vpop.eup %2371 }
 0x20b   :  { %v853_v10 = vadd.f32 1.0, %v2372_v48  ;;  %v3905_v48 = vmov 0.0  }
 0x20c   :  { %v2374_v49 = vpop.eup %2373 }
 0x20d   :  { %2377 = vrcp.f32 %v853_v10  ;;  %v859_v57 = vadd.f32 1.0, %v2374_v49  ;;  %v2376_v53 = vpop.eup %2375 }
 0x20e   :  { %2379 = vtanh.f32 %v848_v52  ;;  %v866_v8 = vadd.f32 1.0, %v2376_v53  ;;  %v3907_v52 = vld [vmem:[#allocation8_spill] sm:$0xff] }
 0x20f   :  { %2381 = vrcp.f32 %v859_v57  ;;  %v3908_v57 = vld [vmem:[#allocation9_spill] sm:$0xff] }
 0x210   :  { %2383 = vrcp.f32 %v866_v8 }
 0x21a   :  { %v2378_v61 = vpop.eup %2377 }
 0x21b   :  { %v2380_v4 = vpop.eup %2379 }
 0x21c   :  { %v2382_v63 = vpop.eup %2381  ;;  %v873_v12 = vmul.f32 %v2380_v4, %v2378_v61 }
 0x21d   :  { %v872_v55 = vmul.f32 %v2382_v63, %v870_v6  ;;  %v2384_v11 = vpop.eup %2383 }
 0x21f   :  { %v3061_v60 = vadd.f32 %v873_v12, %v872_v55 }
 0x221   :  { %2385 = vtanh.f32 %v3061_v60 }
 0x22e   :  { %v2386_v0 = vpop.eup %2385 }
 0x22f   :  { %v876_v10 = vmul.f32 %v2386_v0, %v2384_v11 }
 0x231   :  { %v878_v49 = vrot.slane %v876_v10, 2 }
 0x233   :  { %945 = vmatmul.mubr.f32.vlgmr.msra.gmra.mxu0 %v878_v49  ;;  %1016 = vmatmul.mubr.f32.vlgmr.msra.gmra.mxu1 %v878_v49 }
 0x234   :  { %1069 = vmatpush1.msra.mxu0 %v2693_v13  ;;  %1140 = vmatpush1.msra.mxu1 %v2695_v14  ;;  %v3886_v13 = vld [vmem:[#allocation17_spill] sm:$0xff]  ;;  %v3887_v14 = vld [vmem:[#allocation18_spill] sm:$0xff] }
 0x235   :  { %1070 = vmatprep.subr.mxu0 %v2697_v15  ;;  %1141 = vmatprep.subr.mxu1 %v2699_v16  ;;  %v3888_v15 = vld [vmem:[#allocation19_spill] sm:$0xff]  ;;  %v3889_v16 = vld [vmem:[#allocation20_spill] sm:$0xff] }
 0x236   :  { %1071 = vmatpush1.msra.mxu0 %v2703_v17  ;;  %1142 = vmatpush1.msra.mxu1 %v2705_v18  ;;  %v3890_v17 = vld [vmem:[#allocation21_spill] sm:$0xff]  ;;  %v3891_v18 = vld [vmem:[#allocation22_spill] sm:$0xff] }
 0x237   :  { %1072 = vmatprep.subr.mxu0 %v2709_v19  ;;  %1143 = vmatprep.subr.mxu1 %v2711_v20  ;;  %v3892_v19 = vld [vmem:[#allocation23_spill] sm:$0xff]  ;;  %v3893_v20 = vld [vmem:[#allocation24_spill] sm:$0xff] }
 0x238   :  { %1073 = vmatpush1.msra.mxu0 %v2715_v21  ;;  %1144 = vmatpush1.msra.mxu1 %v2717_v22  ;;  %v3894_v21 = vld [vmem:[#allocation25_spill] sm:$0xff]  ;;  %v3895_v22 = vld [vmem:[#allocation26_spill] sm:$0xff] }
 0x239   :  { %1074 = vmatprep.subr.mxu0 %v2721_v23  ;;  %1145 = vmatprep.subr.mxu1 %v2723_v24  ;;  %v3896_v23 = vld [vmem:[#allocation27_spill] sm:$0xff]  ;;  %v3897_v24 = vld [vmem:[#allocation28_spill] sm:$0xff] }
 0x23a   :  { %1075 = vmatpush1.msra.mxu0 %v2727_v25  ;;  %1146 = vmatpush1.msra.mxu1 %v2729_v26  ;;  %v3898_v25 = vld [vmem:[#allocation29_spill] sm:$0xff]  ;;  %v3899_v26 = vld [vmem:[#allocation30_spill] sm:$0xff] }
 0x23b   :  { %1076 = vmatprep.subr.mxu0 %v2733_v27  ;;  %1147 = vmatprep.subr.mxu1 %v2735_v28  ;;  %v3900_v27 = vld [vmem:[#allocation31_spill] sm:$0xff]  ;;  %v3901_v28 = vld [vmem:[#allocation32_spill] sm:$0xff] }
 0x23c   :  { %1077 = vmatpush1.msra.mxu0 %v2739_v29  ;;  %1148 = vmatpush1.msra.mxu1 %v2741_v30  ;;  %v3902_v29 = vld [vmem:[#allocation33_spill] sm:$0xff]  ;;  %v3903_v30 = vld [vmem:[#allocation34_spill] sm:$0xff] }
 0x23d   :  { %1078 = vmatprep.subr.mxu0 %v2745_v31  ;;  %1149 = vmatprep.subr.mxu1 %v2747_v32 }
 0x23e   :  { %1079 = vmatpush1.msra.mxu0 %v2751_v33  ;;  %1150 = vmatpush1.msra.mxu1 %v2753_v34 }
 0x23f   :  { %1080 = vmatprep.subr.mxu0 %v2757_v35  ;;  %1151 = vmatprep.subr.mxu1 %v2759_v36 }
 0x240   :  { %1081 = vmatpush1.msra.mxu0 %v2763_v37  ;;  %1152 = vmatpush1.msra.mxu1 %v2765_v38 }
 0x241   :  { %1082 = vmatprep.subr.mxu0 %v2769_v39  ;;  %1153 = vmatprep.subr.mxu1 %v2771_v40 }
 0x242   :  { %1083 = vmatpush1.msra.mxu0 %v2775_v41  ;;  %1154 = vmatpush1.msra.mxu1 %v2777_v42 }
 0x243   :  { %1084 = vmatprep.subr.mxu0 %v2781_v43  ;;  %1155 = vmatprep.subr.mxu1 %v2783_v44 }
 0x244   :  { %1085 = vmatpush1.msra.mxu0 %v2787_v45  ;;  %1156 = vmatpush1.msra.mxu1 %v2789_v46 }
 0x245   :  { %1086 = vmatprep.subr.mxu0 %v2793_v47  ;;  %1157 = vmatprep.subr.mxu1 %v3856_v56 }
 0x246   :  { %1087 = vmatpush1.msra.mxu0 %v3857_v1  ;;  %1158 = vmatpush1.msra.mxu1 %v3858_v5 }
 0x247   :  { %1088 = vmatprep.subr.mxu0 %v3859_v7  ;;  %1159 = vmatprep.subr.mxu1 %v3860_v50 }
 0x248   :  { %1089 = vmatpush1.msra.mxu0 %v3861_v3  ;;  %1160 = vmatpush1.msra.mxu1 %v3862_v9 }
 0x249   :  { %1090 = vmatprep.subr.mxu0 %v3886_v13  ;;  %1161 = vmatprep.subr.mxu1 %v3887_v14 }
 0x24a   :  { %1091 = vmatpush1.msra.mxu0 %v3888_v15  ;;  %1162 = vmatpush1.msra.mxu1 %v3889_v16 }
 0x24b   :  { %1092 = vmatprep.subr.mxu0 %v3890_v17  ;;  %1163 = vmatprep.subr.mxu1 %v3891_v18 }
 0x24c   :  { %1093 = vmatpush1.msra.mxu0 %v3892_v19  ;;  %1164 = vmatpush1.msra.mxu1 %v3893_v20 }
 0x24d   :  { %1094 = vmatprep.subr.mxu0 %v3894_v21  ;;  %1165 = vmatprep.subr.mxu1 %v3895_v22 }
 0x24e   :  { %1095 = vmatpush1.msra.mxu0 %v3896_v23  ;;  %1166 = vmatpush1.msra.mxu1 %v3897_v24 }
 0x24f   :  { %1096 = vmatprep.subr.mxu0 %v3898_v25  ;;  %1167 = vmatprep.subr.mxu1 %v3899_v26 }
 0x250   :  { %1097 = vmatpush1.msra.mxu0 %v3900_v27  ;;  %1168 = vmatpush1.msra.mxu1 %v3901_v28 }
 0x251   :  { %1098 = vmatprep.subr.mxu0 %v3902_v29  ;;  %1169 = vmatprep.subr.mxu1 %v3903_v30 }
 0x252   :  { %1099 = vmatpush1.msra.mxu0 %v3904_v2  ;;  %1132 = vmatprep.mubr.f32.mxu0 %v3905_v48 }
 0x253   :  { %1170 = vmatpush1.msra.mxu1 %v3906_v54  ;;  %1203 = vmatprep.mubr.f32.mxu1 %v3905_v48 }
 0x254   :  { %1256 = vmatprep.subr.mxu0 %v3907_v52  ;;  %1327 = vmatprep.subr.mxu1 %v3908_v57 }
 0x2f3   :  { %v946_v53 = vpop.f32.mrf.mxu0  ;;  %v1017_v63 = vpop.f32.mrf.mxu1 }
 0x2f4   :  { %v1026_v61 = vrot.slane %v946_v53, 4  ;;  %v1028_v52 = vrot.slane %v1017_v63, 4 }
 0x2f5   :  { %v948_v4 = vpop.f32.mrf.mxu0  ;;  %v1019_v0 = vpop.f32.mrf.mxu1 }
 0x2f6   :  { %v1034_v6 = vadd.f32 %v1026_v61, %v2972_v58  ;;  %v1027_v8 = vrot.slane %v948_v4, 4  ;;  %v1029_v10 = vrot.slane %v1019_v0, 4  ;;  %v1036_v53 = vadd.f32 %v1028_v52, %v2982_v59  ;;  %v3138_v52 = vld [vmem:[#allocation2 + $0x1e0] sm:$0xff] }
 0x2f8   :  { %v2207_v12 = vmul.f32 -1.442695, %v1034_v6  ;;  %v1035_v55 = vadd.f32 %v1027_v8, %v2974_v51  ;;  %v1037_v49 = vadd.f32 %v1029_v10, %v2978_v62 }
 0x2fa   :  { %2387 = vpow2.f32 %v2207_v12  ;;  %v2208_v11 = vmul.f32 -1.442695, %v1035_v55  ;;  %v2209_v54 = vmul.f32 -1.442695, %v1037_v49  ;;  %v1058_v12 = vrot.slane %v3061_v60, 6  ;;  %v3141_v60 = vld [vmem:[#allocation2 + $0x1f0] sm:$0xff] }
 0x2fc   :  { %2389 = vpow2.f32 %v2208_v11 }
 0x2fd   :  { %2391 = vpow2.f32 %v2209_v54 }
 0x307   :  { %v2388_v57 = vpop.eup %2387 }
 0x308   :  { %v1041_v48 = vadd.f32 1.0, %v2388_v57  ;;  %v3144_v57 = vld [vmem:[#allocation2 + $0x1c8] sm:$0xff] }
 0x309   :  { %v2390_v2 = vpop.eup %2389 }
 0x30a   :  { %2393 = vrcp.f32 %v1041_v48  ;;  %v1047_v61 = vadd.f32 1.0, %v2390_v2  ;;  %v2392_v4 = vpop.eup %2391 }
 0x30b   :  { %2395 = vtanh.f32 %v1036_v53  ;;  %v1054_v11 = vadd.f32 1.0, %v2392_v4  ;;  %v3147_v53 = vld [vmem:[#allocation2 + $0x1d8] sm:$0xff]  ;;  %v3153_v4 = vld [vmem:[#allocation2 + $0x1d0] sm:$0xff] }
 0x30c   :  { %2397 = vrcp.f32 %v1047_v61  ;;  %v3150_v61 = vld [vmem:[#allocation2 + $0x1c0] sm:$0xff] }
 0x30d   :  { %2399 = vrcp.f32 %v1054_v11  ;;  %v3168_v11 = vld [vmem:[#allocation2 + $0x188] sm:$0xff] }
 0x317   :  { %v2394_v6 = vpop.eup %2393 }
 0x318   :  { %v2396_v8 = vpop.eup %2395 }
 0x319   :  { %v2398_v55 = vpop.eup %2397  ;;  %v1061_v0 = vmul.f32 %v2396_v8, %v2394_v6  ;;  %v3156_v6 = vld [vmem:[#allocation2 + $0x1a8] sm:$0xff]  ;;  %v3159_v8 = vld [vmem:[#allocation2 + $0x1b8] sm:$0xff] }
 0x31a   :  { %v1060_v63 = vmul.f32 %v2398_v55, %v1058_v12  ;;  %v2400_v49 = vpop.eup %2399  ;;  %v3162_v12 = vld [vmem:[#allocation2 + $0x1a0] sm:$0xff]  ;;  %v3165_v55 = vld [vmem:[#allocation2 + $0x1b0] sm:$0xff] }
 0x31c   :  { %v3135_v10 = vadd.f32 %v1061_v0, %v1060_v63  ;;  %v3171_v0 = vld [vmem:[#allocation2 + $0x198] sm:$0xff]  ;;  %v3174_v63 = vld [vmem:[#allocation2 + $0x180] sm:$0xff] }
 0x31d   :  { %3909 = vst [vmem:[#allocation10_spill] sm:$0xff] %v3171_v0 }
 0x31e   :  { %2401 = vtanh.f32 %v3135_v10 }
 0x32b   :  { %v2402_v54 = vpop.eup %2401 }
 0x32c   :  { %v1064_v48 = vmul.f32 %v2402_v54, %v2400_v49  ;;  %v3177_v49 = vld [vmem:[#allocation2 + $0x190] sm:$0xff]  ;;  %v3180_v54 = vld [vmem:[#allocation2 + $0x168] sm:$0xff] }
 0x32e   :  { %v1066_v2 = vrot.slane %v1064_v48, 4  ;;  %v3183_v48 = vld [vmem:[#allocation2 + $0x178] sm:$0xff] }
 0x330   :  { %1133 = vmatmul.mubr.f32.vlgmr.msra.gmra.mxu0 %v1066_v2  ;;  %1204 = vmatmul.mubr.f32.vlgmr.msra.gmra.mxu1 %v1066_v2  ;;  %v3186_v2 = vld [vmem:[#allocation2 + $0x160] sm:$0xff] }
 0x331   :  { %1257 = vmatpush1.msra.mxu0 %v3138_v52  ;;  %1328 = vmatpush1.msra.mxu1 %v3141_v60 }
 0x332   :  { %1258 = vmatprep.subr.mxu0 %v3144_v57  ;;  %1329 = vmatprep.subr.mxu1 %v3147_v53 }
 0x333   :  { %1259 = vmatpush1.msra.mxu0 %v3150_v61  ;;  %1330 = vmatpush1.msra.mxu1 %v3153_v4 }
 0x334   :  { %1260 = vmatprep.subr.mxu0 %v3156_v6  ;;  %1331 = vmatprep.subr.mxu1 %v3159_v8 }
 0x335   :  { %1261 = vmatpush1.msra.mxu0 %v3162_v12  ;;  %1332 = vmatpush1.msra.mxu1 %v3165_v55 }
 0x336   :  { %1262 = vmatprep.subr.mxu0 %v3168_v11  ;;  %1333 = vmatprep.subr.mxu1 %v3171_v0  ;;  %v3189_v0 = vld [vmem:[#allocation2 + $0x170] sm:$0xff] }
 0x337   :  { %1263 = vmatpush1.msra.mxu0 %v3174_v63  ;;  %1334 = vmatpush1.msra.mxu1 %v3177_v49 }
 0x338   :  { %1264 = vmatprep.subr.mxu0 %v3180_v54  ;;  %1335 = vmatprep.subr.mxu1 %v3183_v48 }
 0x339   :  { %1265 = vmatpush1.msra.mxu0 %v3186_v2  ;;  %1336 = vmatpush1.msra.mxu1 %v3189_v0 }
 0x33a   :  { %1266 = vmatprep.subr.mxu0 %v2745_v31  ;;  %1337 = vmatprep.subr.mxu1 %v2747_v32  ;;  %v3910_v31 = vld [vmem:[#allocation35_spill] sm:$0xff]  ;;  %v3911_v32 = vmov 0.0  }
 0x33b   :  { %1267 = vmatpush1.msra.mxu0 %v2751_v33  ;;  %1338 = vmatpush1.msra.mxu1 %v2753_v34  ;;  %v3912_v33 = vld [vmem:[#allocation36_spill] sm:$0xff] }
 0x33c   :  { %1268 = vmatprep.subr.mxu0 %v2757_v35  ;;  %1339 = vmatprep.subr.mxu1 %v2759_v36  ;;  %v3238_v34 = vld [vmem:[#allocation2 + $0x1e8] sm:$0xff]  ;;  %v3241_v35 = vld [vmem:[#allocation2 + $0x1f8] sm:$0xff] }
 0x33d   :  { %1269 = vmatpush1.msra.mxu0 %v2763_v37  ;;  %1340 = vmatpush1.msra.mxu1 %v2765_v38  ;;  %3913 = vst [vmem:[#allocation11_spill] sm:$0xff] %v3238_v34  ;;  %3914 = vst [vmem:[#allocation12_spill] sm:$0xff] %v3241_v35 }
 0x33e   :  { %1270 = vmatprep.subr.mxu0 %v2769_v39  ;;  %1341 = vmatprep.subr.mxu1 %v2771_v40 }
 0x33f   :  { %1271 = vmatpush1.msra.mxu0 %v2775_v41  ;;  %1342 = vmatpush1.msra.mxu1 %v2777_v42 }
 0x340   :  { %1272 = vmatprep.subr.mxu0 %v2781_v43  ;;  %1343 = vmatprep.subr.mxu1 %v2783_v44 }
 0x341   :  { %1273 = vmatpush1.msra.mxu0 %v2787_v45  ;;  %1344 = vmatpush1.msra.mxu1 %v2789_v46 }
 0x342   :  { %1274 = vmatprep.subr.mxu0 %v2793_v47  ;;  %1345 = vmatprep.subr.mxu1 %v3856_v56 }
 0x343   :  { %1275 = vmatpush1.msra.mxu0 %v3857_v1  ;;  %1346 = vmatpush1.msra.mxu1 %v3858_v5 }
 0x344   :  { %1276 = vmatprep.subr.mxu0 %v3859_v7  ;;  %1347 = vmatprep.subr.mxu1 %v3860_v50 }
 0x345   :  { %1277 = vmatpush1.msra.mxu0 %v3861_v3  ;;  %1348 = vmatpush1.msra.mxu1 %v3862_v9 }
 0x346   :  { %1278 = vmatprep.subr.mxu0 %v3886_v13  ;;  %1349 = vmatprep.subr.mxu1 %v3887_v14  ;;  %v1246_v14 = vrot.slane %v3135_v10, 6  ;;  %v3294_v10 = vld [vmem:[#allocation2 + $0x108] sm:$0xff] }
 0x347   :  { %1279 = vmatpush1.msra.mxu0 %v3888_v15  ;;  %1350 = vmatpush1.msra.mxu1 %v3889_v16 }
 0x348   :  { %1280 = vmatprep.subr.mxu0 %v3890_v17  ;;  %1351 = vmatprep.subr.mxu1 %v3891_v18 }
 0x349   :  { %1281 = vmatpush1.msra.mxu0 %v3892_v19  ;;  %1352 = vmatpush1.msra.mxu1 %v3893_v20 }
 0x34a   :  { %1282 = vmatprep.subr.mxu0 %v3894_v21  ;;  %1353 = vmatprep.subr.mxu1 %v3895_v22  ;;  %v3915_v22 = vld [vmem:[#allocation10_spill] sm:$0xff] }
 0x34b   :  { %1283 = vmatpush1.msra.mxu0 %v3896_v23  ;;  %1354 = vmatpush1.msra.mxu1 %v3897_v24  ;;  %v3270_v23 = vld [vmem:[#allocation2 + $0x148] sm:$0xff]  ;;  %v3273_v24 = vld [vmem:[#allocation2 + $0x158] sm:$0xff] }
 0x34c   :  { %1284 = vmatprep.subr.mxu0 %v3898_v25  ;;  %1355 = vmatprep.subr.mxu1 %v3899_v26  ;;  %v3276_v25 = vld [vmem:[#allocation2 + $0x140] sm:$0xff]  ;;  %v3279_v26 = vld [vmem:[#allocation2 + $0x150] sm:$0xff] }
 0x34d   :  { %1285 = vmatpush1.msra.mxu0 %v3900_v27  ;;  %1356 = vmatpush1.msra.mxu1 %v3901_v28  ;;  %v3282_v27 = vld [vmem:[#allocation2 + $0x128] sm:$0xff]  ;;  %v3285_v28 = vld [vmem:[#allocation2 + $0x138] sm:$0xff] }
 0x34e   :  { %1286 = vmatprep.subr.mxu0 %v3902_v29  ;;  %1357 = vmatprep.subr.mxu1 %v3903_v30  ;;  %v3288_v29 = vld [vmem:[#allocation2 + $0x120] sm:$0xff]  ;;  %v3291_v30 = vld [vmem:[#allocation2 + $0x130] sm:$0xff] }
 0x34f   :  { %1287 = vmatpush1.msra.mxu0 %v3910_v31  ;;  %1320 = vmatprep.mubr.f32.mxu0 %v3911_v32  ;;  %v3297_v31 = vld [vmem:[#allocation2 + $0x118] sm:$0xff] }
 0x350   :  { %1358 = vmatpush1.msra.mxu1 %v3912_v33  ;;  %1391 = vmatprep.mubr.f32.mxu1 %v3911_v32  ;;  %v3300_v33 = vld [vmem:[#allocation2 + $0x100] sm:$0xff] }
 0x351   :  { %1429 = vmatprep.subr.mxu0 %v3238_v34  ;;  %1500 = vmatprep.subr.mxu1 %v3241_v35 }
 0x3f0   :  { %v1134_v36 = vpop.f32.mrf.mxu0  ;;  %v1205_v40 = vpop.f32.mrf.mxu1 }
 0x3f1   :  { %v1214_v37 = vrot.slane %v1134_v36, 2  ;;  %v1216_v56 = vrot.slane %v1205_v40, 2  ;;  %v3303_v36 = vld [vmem:[#allocation2 + $0x110] sm:$0xff] }
 0x3f2   :  { %v1136_v38 = vpop.f32.mrf.mxu0  ;;  %v1207_v45 = vpop.f32.mrf.mxu1  ;;  %v3315_v40 = vld [vmem:[#allocation2 + $0xf0] sm:$0xff] }
 0x3f3   :  { %v1222_v39 = vadd.f32 %v1214_v37, %v2972_v58  ;;  %v1215_v41 = vrot.slane %v1136_v38, 2  ;;  %v1217_v46 = vrot.slane %v1207_v45, 2  ;;  %v1224_v7 = vadd.f32 %v1216_v56, %v2982_v59  ;;  %v3306_v37 = vld [vmem:[#allocation2 + $0xe8] sm:$0xff]  ;;  %v3309_v38 = vld [vmem:[#allocation2 + $0xf8] sm:$0xff]  ;;  %v3339_v56 = vld [vmem:[#allocation2 + $0xb0] sm:$0xff] }
 0x3f4   :  { %v3330_v45 = vld [vmem:[#allocation2 + $0xa8] sm:$0xff] }
 0x3f5   :  { %v2210_v42 = vmul.f32 -1.442695, %v1222_v39  ;;  %v1223_v43 = vadd.f32 %v1215_v41, %v2974_v51  ;;  %v1225_v47 = vadd.f32 %v1217_v46, %v2978_v62  ;;  %v3312_v39 = vld [vmem:[#allocation2 + $0xe0] sm:$0xff]  ;;  %v3318_v41 = vld [vmem:[#allocation2 + $0xc8] sm:$0xff]  ;;  %v3333_v46 = vld [vmem:[#allocation2 + $0xb8] sm:$0xff] }
 0x3f7   :  { %2403 = vpow2.f32 %v2210_v42  ;;  %v2211_v44 = vmul.f32 -1.442695, %v1223_v43  ;;  %v2212_v1 = vmul.f32 -1.442695, %v1225_v47  ;;  %v3321_v42 = vld [vmem:[#allocation2 + $0xd8] sm:$0xff]  ;;  %v3324_v43 = vld [vmem:[#allocation2 + $0xc0] sm:$0xff] }
 0x3f8   :  { %v3336_v47 = vld [vmem:[#allocation2 + $0xa0] sm:$0xff] }
 0x3f9   :  { %2405 = vpow2.f32 %v2211_v44  ;;  %v3327_v44 = vld [vmem:[#allocation2 + $0xd0] sm:$0xff] }
 0x3fa   :  { %2407 = vpow2.f32 %v2212_v1  ;;  %v3342_v1 = vld [vmem:[#allocation2 + $0x88] sm:$0xff] }
 0x3fb   :  { %3916 = vst [vmem:[#allocation13_spill] sm:$0xff] %v3342_v1 }
 0x404   :  { %v2404_v5 = vpop.eup %2403 }
 0x405   :  { %v1229_v50 = vadd.f32 1.0, %v2404_v5  ;;  %v3345_v5 = vld [vmem:[#allocation2 + $0x98] sm:$0xff] }
 0x406   :  { %v2406_v3 = vpop.eup %2405  ;;  %3917 = vst [vmem:[#allocation14_spill] sm:$0xff] %v3345_v5 }
 0x407   :  { %2409 = vrcp.f32 %v1229_v50  ;;  %v1235_v58 = vadd.f32 1.0, %v2406_v3  ;;  %v2408_v51 = vpop.eup %2407  ;;  %v3351_v50 = vld [vmem:[#allocation2 + $0x90] sm:$0xff]  ;;  %v3354_v3 = vld [vmem:[#allocation2 + $0x68] sm:$0xff] }
 0x408   :  { %2411 = vtanh.f32 %v1224_v7  ;;  %v1242_v16 = vadd.f32 1.0, %v2408_v51  ;;  %v3348_v7 = vld [vmem:[#allocation2 + $0x80] sm:$0xff]  ;;  %3919 = vst [vmem:[#allocation16_spill] sm:$0xff] %v3351_v50  ;;  %3920 = vst [vmem:[#allocation17_spill] sm:$0xff] %v3354_v3 }
 0x409   :  { %2413 = vrcp.f32 %v1235_v58  ;;  %3918 = vst [vmem:[#allocation15_spill] sm:$0xff] %v3348_v7  ;;  %v3357_v58 = vld [vmem:[#allocation2 + $0x78] sm:$0xff]  ;;  %v3360_v51 = vld [vmem:[#allocation2 + $0x60] sm:$0xff] }
 0x40a   :  { %2415 = vrcp.f32 %v1242_v16  ;;  %3921 = vst [vmem:[#allocation18_spill] sm:$0xff] %v3357_v58  ;;  %3922 = vst [vmem:[#allocation19_spill] sm:$0xff] %v3360_v51  ;;  %v3375_v16 = vld [vmem:[#allocation2 + $0x50] sm:$0xff] }
 0x40b   :  { %3927 = vst [vmem:[#allocation24_spill] sm:$0xff] %v3375_v16 }
 0x414   :  { %v2410_v9 = vpop.eup %2409 }
 0x415   :  { %v2412_v13 = vpop.eup %2411 }
 0x416   :  { %v2414_v15 = vpop.eup %2413  ;;  %v1249_v62 = vmul.f32 %v2412_v13, %v2410_v9  ;;  %v3363_v9 = vld [vmem:[#allocation2 + $0x70] sm:$0xff]  ;;  %v3366_v13 = vld [vmem:[#allocation2 + $0x48] sm:$0xff] }
 0x417   :  { %v1248_v17 = vmul.f32 %v2414_v15, %v1246_v14  ;;  %v2416_v59 = vpop.eup %2415  ;;  %3923 = vst [vmem:[#allocation20_spill] sm:$0xff] %v3363_v9  ;;  %3924 = vst [vmem:[#allocation21_spill] sm:$0xff] %v3366_v13  ;;  %v3369_v14 = vld [vmem:[#allocation2 + $0x58] sm:$0xff]  ;;  %v3372_v15 = vld [vmem:[#allocation2 + $0x40] sm:$0xff] }
 0x418   :  { %3925 = vst [vmem:[#allocation22_spill] sm:$0xff] %v3369_v14  ;;  %3926 = vst [vmem:[#allocation23_spill] sm:$0xff] %v3372_v15 }
 0x419   :  { %v3249_v18 = vadd.f32 %v1249_v62, %v1248_v17  ;;  %v3378_v62 = vld [vmem:[#allocation2 + $0x28] sm:$0xff]  ;;  %v3381_v17 = vld [vmem:[#allocation2 + $0x38] sm:$0xff] }
 0x41a   :  { %3928 = vst [vmem:[#allocation25_spill] sm:$0xff] %v3378_v62  ;;  %3929 = vst [vmem:[#allocation26_spill] sm:$0xff] %v3381_v17 }
 0x41b   :  { %2417 = vtanh.f32 %v3249_v18 }
 0x428   :  { %v2418_v19 = vpop.eup %2417 }
 0x429   :  { %v1252_v20 = vmul.f32 %v2418_v19, %v2416_v59  ;;  %v3384_v59 = vld [vmem:[#allocation2 + $0x20] sm:$0xff]  ;;  %v3387_v19 = vld [vmem:[#allocation2 + $0x30] sm:$0xff] }
 0x42a   :  { %3930 = vst [vmem:[#allocation27_spill] sm:$0xff] %v3384_v59  ;;  %3931 = vst [vmem:[#allocation28_spill] sm:$0xff] %v3387_v19 }
 0x42b   :  { %v1254_v21 = vrot.slane %v1252_v20, 6  ;;  %v3390_v20 = vld [vmem:[#allocation2 + $0x8] sm:$0xff] }
 0x42c   :  { %3932 = vst [vmem:[#allocation29_spill] sm:$0xff] %v3390_v20 }
 0x42d   :  { %1321 = vmatmul.mubr.f32.vlgmr.msra.gmra.mxu0 %v1254_v21  ;;  %1392 = vmatmul.mubr.f32.vlgmr.msra.gmra.mxu1 %v1254_v21  ;;  %v3393_v21 = vld [vmem:[#allocation2 + $0x18] sm:$0xff] }
 0x42e   :  { %1430 = vmatpush1.msra.mxu0 %v3138_v52  ;;  %1501 = vmatpush1.msra.mxu1 %v3141_v60  ;;  %3933 = vst [vmem:[#allocation30_spill] sm:$0xff] %v3393_v21 }
 0x42f   :  { %1431 = vmatprep.subr.mxu0 %v3144_v57  ;;  %1502 = vmatprep.subr.mxu1 %v3147_v53 }
 0x430   :  { %1432 = vmatpush1.msra.mxu0 %v3150_v61  ;;  %1503 = vmatpush1.msra.mxu1 %v3153_v4 }
 0x431   :  { %1433 = vmatprep.subr.mxu0 %v3156_v6  ;;  %1504 = vmatprep.subr.mxu1 %v3159_v8 }
 0x432   :  { %1434 = vmatpush1.msra.mxu0 %v3162_v12  ;;  %1505 = vmatpush1.msra.mxu1 %v3165_v55 }
 0x433   :  { %1435 = vmatprep.subr.mxu0 %v3168_v11  ;;  %1506 = vmatprep.subr.mxu1 %v3915_v22 }
 0x434   :  { %1436 = vmatpush1.msra.mxu0 %v3174_v63  ;;  %1507 = vmatpush1.msra.mxu1 %v3177_v49 }
 0x435   :  { %1437 = vmatprep.subr.mxu0 %v3180_v54  ;;  %1508 = vmatprep.subr.mxu1 %v3183_v48 }
 0x436   :  { %1438 = vmatpush1.msra.mxu0 %v3186_v2  ;;  %1509 = vmatpush1.msra.mxu1 %v3189_v0 }
 0x437   :  { %1439 = vmatprep.subr.mxu0 %v3270_v23  ;;  %1510 = vmatprep.subr.mxu1 %v3273_v24 }
 0x438   :  { %1440 = vmatpush1.msra.mxu0 %v3276_v25  ;;  %1511 = vmatpush1.msra.mxu1 %v3279_v26 }
 0x439   :  { %1441 = vmatprep.subr.mxu0 %v3282_v27  ;;  %1512 = vmatprep.subr.mxu1 %v3285_v28 }
 0x43a   :  { %1442 = vmatpush1.msra.mxu0 %v3288_v29  ;;  %1513 = vmatpush1.msra.mxu1 %v3291_v30 }
 0x43b   :  { %1443 = vmatprep.subr.mxu0 %v3294_v10  ;;  %1514 = vmatprep.subr.mxu1 %v3297_v31 }
 0x43c   :  { %1444 = vmatpush1.msra.mxu0 %v3300_v33  ;;  %1515 = vmatpush1.msra.mxu1 %v3303_v36 }
 0x43d   :  { %1445 = vmatprep.subr.mxu0 %v3306_v37  ;;  %1516 = vmatprep.subr.mxu1 %v3309_v38 }
 0x43e   :  { %1446 = vmatpush1.msra.mxu0 %v3312_v39  ;;  %1517 = vmatpush1.msra.mxu1 %v3315_v40 }
 0x43f   :  { %1447 = vmatprep.subr.mxu0 %v3318_v41  ;;  %1518 = vmatprep.subr.mxu1 %v3321_v42 }
 0x440   :  { %1448 = vmatpush1.msra.mxu0 %v3324_v43  ;;  %1519 = vmatpush1.msra.mxu1 %v3327_v44 }
 0x441   :  { %1449 = vmatprep.subr.mxu0 %v3330_v45  ;;  %1520 = vmatprep.subr.mxu1 %v3333_v46 }
 0x442   :  { %1450 = vmatpush1.msra.mxu0 %v3336_v47  ;;  %1521 = vmatpush1.msra.mxu1 %v3339_v56 }
 0x443   :  { %1451 = vmatprep.subr.mxu0 %v3342_v1  ;;  %1522 = vmatprep.subr.mxu1 %v3345_v5 }
 0x444   :  { %1452 = vmatpush1.msra.mxu0 %v3348_v7  ;;  %1523 = vmatpush1.msra.mxu1 %v3351_v50 }
 0x445   :  { %1453 = vmatprep.subr.mxu0 %v3354_v3  ;;  %1524 = vmatprep.subr.mxu1 %v3357_v58  ;;  %v3939_v3 = vld [vmem:[#allocation38_spill] sm:$0xff] }
 0x446   :  { %1454 = vmatpush1.msra.mxu0 %v3360_v51  ;;  %1525 = vmatpush1.msra.mxu1 %v3363_v9  ;;  %v3938_v51 = vld [vmem:[#allocation40_spill] sm:$0xff] }
 0x447   :  { %1455 = vmatprep.subr.mxu0 %v3366_v13  ;;  %1526 = vmatprep.subr.mxu1 %v3369_v14 }
 0x448   :  { %1456 = vmatpush1.msra.mxu0 %v3372_v15  ;;  %1527 = vmatpush1.msra.mxu1 %v3375_v16  ;;  %v3937_v15 = vld [vmem:[#allocation39_spill] sm:$0xff] }
 0x449   :  { %1457 = vmatprep.subr.mxu0 %v3378_v62  ;;  %1528 = vmatprep.subr.mxu1 %v3381_v17  ;;  %v3396_v62 = vld [vmem:[#allocation2] sm:$0xff]  ;;  %v3400_v17 = vld [vmem:[#allocation2 + $0x10] sm:$0xff] }
 0x44a   :  { %1458 = vmatpush1.msra.mxu0 %v3384_v59  ;;  %1529 = vmatpush1.msra.mxu1 %v3387_v19  ;;  %3934 = vst [vmem:[#allocation31_spill] sm:$0xff] %v3396_v62  ;;  %3935 = vst [vmem:[#allocation32_spill] sm:$0xff] %v3400_v17  ;;  %v3936_v19 = vld [vmem:[#allocation37_spill] sm:$0xff] }
 0x44b   :  { %1459 = vmatprep.subr.mxu0 %v3390_v20  ;;  %1530 = vmatprep.subr.mxu1 %v3393_v21 }
 0x44c   :  { %1460 = vmatpush1.msra.mxu0 %v3396_v62  ;;  %1493 = vmatprep.mubr.f32.mxu0 %v3911_v32 }
 0x44d   :  { %1531 = vmatpush1.msra.mxu1 %v3400_v17  ;;  %1564 = vmatprep.mubr.f32.mxu1 %v3911_v32 }
 0x44e   :  { %1617 = vmatprep.subr.mxu0 %v3238_v34  ;;  %1688 = vmatprep.subr.mxu1 %v3241_v35 }
 0x4ed   :  { %v1322_v20 = vpop.f32.mrf.mxu0  ;;  %v1393_v62 = vpop.f32.mrf.mxu1 }
 0x4ee   :  { %v1398_v59 = vadd.f32 %v1322_v20, %v3936_v19  ;;  %v1400_v34 = vadd.f32 %v1393_v62, %v3939_v3  ;;  %v3944_v62 = vld [vmem:[#allocation20_spill] sm:$0xff] }
 0x4ef   :  { %v1324_v21 = vpop.f32.mrf.mxu0  ;;  %v1395_v9 = vpop.f32.mrf.mxu1 }
 0x4f0   :  { %v2213_v16 = vmul.f32 -1.442695, %v1398_v59  ;;  %v1399_v14 = vadd.f32 %v1324_v21, %v3937_v15  ;;  %v1401_v17 = vadd.f32 %v1395_v9, %v3938_v51 }
 0x4f2   :  { %2419 = vpow2.f32 %v2213_v16  ;;  %v2214_v13 = vmul.f32 -1.442695, %v1399_v14  ;;  %v2215_v58 = vmul.f32 -1.442695, %v1401_v17  ;;  %v1422_v14 = vrot.slane %v3249_v18, 6  ;;  %v3942_v18 = vld [vmem:[#allocation18_spill] sm:$0xff] }
 0x4f4   :  { %2421 = vpow2.f32 %v2214_v13 }
 0x4f5   :  { %2423 = vpow2.f32 %v2215_v58 }
 0x4ff   :  { %v2420_v32 = vpop.eup %2419 }
 0x500   :  { %v1405_v50 = vadd.f32 1.0, %v2420_v32 }
 0x501   :  { %v2422_v35 = vpop.eup %2421 }
 0x502   :  { %2425 = vrcp.f32 %v1405_v50  ;;  %v1411_v20 = vadd.f32 1.0, %v2422_v35  ;;  %v2424_v59 = vpop.eup %2423  ;;  %v3941_v35 = vld [vmem:[#allocation17_spill] sm:$0xff] }
 0x503   :  { %2427 = vtanh.f32 %v1400_v34  ;;  %v1418_v15 = vadd.f32 1.0, %v2424_v59  ;;  %v3940_v34 = vld [vmem:[#allocation16_spill] sm:$0xff]  ;;  %v3947_v59 = vld [vmem:[#allocation23_spill] sm:$0xff] }
 0x504   :  { %2429 = vrcp.f32 %v1411_v20  ;;  %v3946_v20 = vld [vmem:[#allocation22_spill] sm:$0xff] }
 0x505   :  { %2431 = vrcp.f32 %v1418_v15  ;;  %v3943_v15 = vld [vmem:[#allocation19_spill] sm:$0xff] }
 0x50f   :  { %v2426_v21 = vpop.eup %2425 }
 0x510   :  { %v2428_v16 = vpop.eup %2427 }
 0x511   :  { %v2430_v13 = vpop.eup %2429  ;;  %v1425_v19 = vmul.f32 %v2428_v16, %v2426_v21  ;;  %v3948_v21 = vld [vmem:[#allocation24_spill] sm:$0xff]  ;;  %v3949_v16 = vld [vmem:[#allocation25_spill] sm:$0xff] }
 0x512   :  { %v1424_v9 = vmul.f32 %v2430_v13, %v1422_v14  ;;  %v2432_v32 = vpop.eup %2431  ;;  %v3950_v14 = vld [vmem:[#allocation26_spill] sm:$0xff]  ;;  %v3951_v13 = vld [vmem:[#allocation27_spill] sm:$0xff] }
 0x514   :  { %v3411_v17 = vadd.f32 %v1425_v19, %v1424_v9  ;;  %v3945_v19 = vld [vmem:[#allocation21_spill] sm:$0xff]  ;;  %v3952_v9 = vld [vmem:[#allocation28_spill] sm:$0xff] }
 0x516   :  { %2433 = vtanh.f32 %v3411_v17 }
 0x523   :  { %v2434_v58 = vpop.eup %2433 }
 0x524   :  { %v1428_v50 = vmul.f32 %v2434_v58, %v2432_v32  ;;  %v3953_v32 = vld [vmem:[#allocation29_spill] sm:$0xff]  ;;  %v3954_v58 = vld [vmem:[#allocation30_spill] sm:$0xff] }
 0x526   :  { %1494 = vmatmul.mubr.f32.vlgmr.msra.gmra.mxu0 %v1428_v50  ;;  %1565 = vmatmul.mubr.f32.vlgmr.msra.gmra.mxu1 %v1428_v50  ;;  %v3955_v50 = vld [vmem:[#allocation31_spill] sm:$0xff] }
 0x527   :  { %1618 = vmatpush1.msra.mxu0 %v3138_v52  ;;  %1689 = vmatpush1.msra.mxu1 %v3141_v60 }
 0x528   :  { %1619 = vmatprep.subr.mxu0 %v3144_v57  ;;  %1690 = vmatprep.subr.mxu1 %v3147_v53 }
 0x529   :  { %1620 = vmatpush1.msra.mxu0 %v3150_v61  ;;  %1691 = vmatpush1.msra.mxu1 %v3153_v4 }
 0x52a   :  { %1621 = vmatprep.subr.mxu0 %v3156_v6  ;;  %1692 = vmatprep.subr.mxu1 %v3159_v8 }
 0x52b   :  { %1622 = vmatpush1.msra.mxu0 %v3162_v12  ;;  %1693 = vmatpush1.msra.mxu1 %v3165_v55 }
 0x52c   :  { %1623 = vmatprep.subr.mxu0 %v3168_v11  ;;  %1694 = vmatprep.subr.mxu1 %v3915_v22 }
 0x52d   :  { %1624 = vmatpush1.msra.mxu0 %v3174_v63  ;;  %1695 = vmatpush1.msra.mxu1 %v3177_v49 }
 0x52e   :  { %1625 = vmatprep.subr.mxu0 %v3180_v54  ;;  %1696 = vmatprep.subr.mxu1 %v3183_v48 }
 0x52f   :  { %1626 = vmatpush1.msra.mxu0 %v3186_v2  ;;  %1697 = vmatpush1.msra.mxu1 %v3189_v0 }
 0x530   :  { %1627 = vmatprep.subr.mxu0 %v3270_v23  ;;  %1698 = vmatprep.subr.mxu1 %v3273_v24 }
 0x531   :  { %1628 = vmatpush1.msra.mxu0 %v3276_v25  ;;  %1699 = vmatpush1.msra.mxu1 %v3279_v26 }
 0x532   :  { %1629 = vmatprep.subr.mxu0 %v3282_v27  ;;  %1700 = vmatprep.subr.mxu1 %v3285_v28 }
 0x533   :  { %1630 = vmatpush1.msra.mxu0 %v3288_v29  ;;  %1701 = vmatpush1.msra.mxu1 %v3291_v30 }
 0x534   :  { %1631 = vmatprep.subr.mxu0 %v3294_v10  ;;  %1702 = vmatprep.subr.mxu1 %v3297_v31 }
 0x535   :  { %1632 = vmatpush1.msra.mxu0 %v3300_v33  ;;  %1703 = vmatpush1.msra.mxu1 %v3303_v36 }
 0x536   :  { %1633 = vmatprep.subr.mxu0 %v3306_v37  ;;  %1704 = vmatprep.subr.mxu1 %v3309_v38 }
 0x537   :  { %1634 = vmatpush1.msra.mxu0 %v3312_v39  ;;  %1705 = vmatpush1.msra.mxu1 %v3315_v40 }
 0x538   :  { %1635 = vmatprep.subr.mxu0 %v3318_v41  ;;  %1706 = vmatprep.subr.mxu1 %v3321_v42 }
 0x539   :  { %1636 = vmatpush1.msra.mxu0 %v3324_v43  ;;  %1707 = vmatpush1.msra.mxu1 %v3327_v44 }
 0x53a   :  { %1637 = vmatprep.subr.mxu0 %v3330_v45  ;;  %1708 = vmatprep.subr.mxu1 %v3333_v46 }
 0x53b   :  { %1638 = vmatpush1.msra.mxu0 %v3336_v47  ;;  %1709 = vmatpush1.msra.mxu1 %v3339_v56 }
 0x53c   :  { %1639 = vmatprep.subr.mxu0 %v3342_v1  ;;  %1710 = vmatprep.subr.mxu1 %v3345_v5 }
 0x53d   :  { %1640 = vmatpush1.msra.mxu0 %v3348_v7  ;;  %1711 = vmatpush1.msra.mxu1 %v3940_v34 }
 0x53e   :  { %1641 = vmatprep.subr.mxu0 %v3941_v35  ;;  %1712 = vmatprep.subr.mxu1 %v3942_v18  ;;  %v3961_v18 = vld [vmem:[#allocation39_spill] sm:$0xff] }
 0x53f   :  { %1642 = vmatpush1.msra.mxu0 %v3943_v15  ;;  %1713 = vmatpush1.msra.mxu1 %v3944_v62 }
 0x540   :  { %1643 = vmatprep.subr.mxu0 %v3945_v19  ;;  %1714 = vmatprep.subr.mxu1 %v3946_v20  ;;  %v3956_v19 = vmov 0.0   ;;  %v3957_v20 = vld [vmem:[#allocation32_spill] sm:$0xff] }
 0x541   :  { %1644 = vmatpush1.msra.mxu0 %v3947_v59  ;;  %1715 = vmatpush1.msra.mxu1 %v3948_v21  ;;  %v3958_v21 = vld [vmem:[#allocation11_spill] sm:$0xff] }
 0x542   :  { %1645 = vmatprep.subr.mxu0 %v3949_v16  ;;  %1716 = vmatprep.subr.mxu1 %v3950_v14  ;;  %v3959_v16 = vld [vmem:[#allocation12_spill] sm:$0xff] }
 0x543   :  { %1646 = vmatpush1.msra.mxu0 %v3951_v13  ;;  %1717 = vmatpush1.msra.mxu1 %v3952_v9  ;;  %v3960_v9 = vld [vmem:[#allocation37_spill] sm:$0xff] }
 0x544   :  { %1647 = vmatprep.subr.mxu0 %v3953_v32  ;;  %1718 = vmatprep.subr.mxu1 %v3954_v58 }
 0x545   :  { %1648 = vmatpush1.msra.mxu0 %v3955_v50  ;;  %1681 = vmatprep.mubr.f32.mxu0 %v3956_v19 }
 0x546   :  { %1719 = vmatpush1.msra.mxu1 %v3957_v20  ;;  %1752 = vmatprep.mubr.f32.mxu1 %v3956_v19 }
 0x547   :  { %1805 = vmatprep.subr.mxu0 %v3958_v21  ;;  %1876 = vmatprep.subr.mxu1 %v3959_v16 }
 0x5e6   :  { %v1495_v14 = vpop.f32.mrf.mxu0  ;;  %v1566_v32 = vpop.f32.mrf.mxu1 }
 0x5e7   :  { %v1575_v13 = vrot.slane %v1495_v14, 6  ;;  %v1577_v21 = vrot.slane %v1566_v32, 6 }
 0x5e8   :  { %v1497_v59 = vpop.f32.mrf.mxu0  ;;  %v1568_v34 = vpop.f32.mrf.mxu1 }
 0x5e9   :  { %v1583_v62 = vadd.f32 %v1575_v13, %v3960_v9  ;;  %v1576_v15 = vrot.slane %v1497_v59, 6  ;;  %v1578_v20 = vrot.slane %v1568_v34, 6  ;;  %v1585_v14 = vadd.f32 %v1577_v21, %v3939_v3 }
 0x5eb   :  { %v2216_v58 = vmul.f32 -1.442695, %v1583_v62  ;;  %v1584_v50 = vadd.f32 %v1576_v15, %v3961_v18  ;;  %v1586_v19 = vadd.f32 %v1578_v20, %v3938_v51 }
 0x5ed   :  { %2435 = vpow2.f32 %v2216_v58  ;;  %v2217_v35 = vmul.f32 -1.442695, %v1584_v50  ;;  %v2218_v7 = vmul.f32 -1.442695, %v1586_v19 }
 0x5ef   :  { %2437 = vpow2.f32 %v2217_v35  ;;  %v1607_v35 = vrot.slane %v3411_v17, 6 }
 0x5f0   :  { %2439 = vpow2.f32 %v2218_v7 }
 0x5fa   :  { %v2436_v16 = vpop.eup %2435 }
 0x5fb   :  { %v1590_v5 = vadd.f32 1.0, %v2436_v16 }
 0x5fc   :  { %v2438_v1 = vpop.eup %2437 }
 0x5fd   :  { %2441 = vrcp.f32 %v1590_v5  ;;  %v1596_v59 = vadd.f32 1.0, %v2438_v1  ;;  %v2440_v15 = vpop.eup %2439 }
 0x5fe   :  { %2443 = vtanh.f32 %v1585_v14  ;;  %v1603_v58 = vadd.f32 1.0, %v2440_v15 }
 0x5ff   :  { %2445 = vrcp.f32 %v1596_v59 }
 0x600   :  { %2447 = vrcp.f32 %v1603_v58 }
 0x60a   :  { %v2442_v62 = vpop.eup %2441 }
 0x60b   :  { %v2444_v13 = vpop.eup %2443 }
 0x60c   :  { %v2446_v34 = vpop.eup %2445  ;;  %v1610_v20 = vmul.f32 %v2444_v13, %v2442_v62 }
 0x60d   :  { %v1609_v32 = vmul.f32 %v2446_v34, %v1607_v35  ;;  %v2448_v50 = vpop.eup %2447 }
 0x60f   :  { %v3485_v19 = vadd.f32 %v1610_v20, %v1609_v32  ;;  %v521_v20 = vld [vmem:[%s3706_s4 + $0xf8] sm:$0xff]  ;;  %v520_v32 = vld [vmem:[%s3706_s4 + $0xf0] sm:$0xff] }
 0x611   :  { %2449 = vtanh.f32 %v3485_v19  ;;  %v1795_v21 = vrot.slane %v3485_v19, 6  ;;  %v519_v19 = vld [vmem:[%s3706_s4 + $0xe8] sm:$0xff] }
 0x61e   :  { %v2450_v7 = vpop.eup %2449 }
 0x61f   :  { %v1613_v5 = vmul.f32 %v2450_v7, %v2448_v50  ;;  %v518_v50 = vld [vmem:[%s3706_s4 + $0xe0] sm:$0xff]  ;;  %v517_v7 = vld [vmem:[%s3706_s4 + $0xd8] sm:$0xff] }
 0x621   :  { %v1615_v1 = vrot.slane %v1613_v5, 2  ;;  %v516_v5 = vld [vmem:[%s3706_s4 + $0xd0] sm:$0xff] }
 0x623   :  { %1682 = vmatmul.mubr.f32.vlgmr.msra.gmra.mxu0 %v1615_v1  ;;  %1753 = vmatmul.mubr.f32.vlgmr.msra.gmra.mxu1 %v1615_v1  ;;  %v515_v1 = vld [vmem:[%s3706_s4 + $0xc8] sm:$0xff] }
 0x624   :  { %1806 = vmatpush1.msra.mxu0 %v3138_v52  ;;  %1877 = vmatpush1.msra.mxu1 %v3141_v60  ;;  %v3962_v52 = vld [vmem:[#allocation13_spill] sm:$0xff]  ;;  %v3963_v60 = vld [vmem:[#allocation14_spill] sm:$0xff] }
 0x625   :  { %1807 = vmatprep.subr.mxu0 %v3144_v57  ;;  %1878 = vmatprep.subr.mxu1 %v3147_v53  ;;  %v3964_v57 = vld [vmem:[#allocation15_spill] sm:$0xff]  ;;  %v3965_v53 = vld [vmem:[#allocation16_spill] sm:$0xff] }
 0x626   :  { %1808 = vmatpush1.msra.mxu0 %v3150_v61  ;;  %1879 = vmatpush1.msra.mxu1 %v3153_v4  ;;  %v3966_v61 = vld [vmem:[#allocation17_spill] sm:$0xff]  ;;  %v3967_v4 = vld [vmem:[#allocation18_spill] sm:$0xff] }
 0x627   :  { %1809 = vmatprep.subr.mxu0 %v3156_v6  ;;  %1880 = vmatprep.subr.mxu1 %v3159_v8  ;;  %v3968_v6 = vld [vmem:[#allocation19_spill] sm:$0xff]  ;;  %v3969_v8 = vld [vmem:[#allocation20_spill] sm:$0xff] }
 0x628   :  { %1810 = vmatpush1.msra.mxu0 %v3162_v12  ;;  %1881 = vmatpush1.msra.mxu1 %v3165_v55  ;;  %v3970_v12 = vld [vmem:[#allocation21_spill] sm:$0xff]  ;;  %v3971_v55 = vld [vmem:[#allocation22_spill] sm:$0xff] }
 0x629   :  { %1811 = vmatprep.subr.mxu0 %v3168_v11  ;;  %1882 = vmatprep.subr.mxu1 %v3915_v22  ;;  %v3972_v11 = vld [vmem:[#allocation23_spill] sm:$0xff]  ;;  %v3979_v22 = vld [vmem:[#allocation30_spill] sm:$0xff] }
 0x62a   :  { %1812 = vmatpush1.msra.mxu0 %v3174_v63  ;;  %1883 = vmatpush1.msra.mxu1 %v3177_v49  ;;  %v3974_v63 = vld [vmem:[#allocation25_spill] sm:$0xff]  ;;  %v3975_v49 = vld [vmem:[#allocation26_spill] sm:$0xff] }
 0x62b   :  { %1813 = vmatprep.subr.mxu0 %v3180_v54  ;;  %1884 = vmatprep.subr.mxu1 %v3183_v48  ;;  %v3976_v54 = vld [vmem:[#allocation27_spill] sm:$0xff]  ;;  %v3977_v48 = vld [vmem:[#allocation28_spill] sm:$0xff] }
 0x62c   :  { %1814 = vmatpush1.msra.mxu0 %v3186_v2  ;;  %1885 = vmatpush1.msra.mxu1 %v3189_v0  ;;  %v3973_v0 = vld [vmem:[#allocation24_spill] sm:$0xff]  ;;  %v3978_v2 = vld [vmem:[#allocation29_spill] sm:$0xff] }
 0x62d   :  { %1815 = vmatprep.subr.mxu0 %v3270_v23  ;;  %1886 = vmatprep.subr.mxu1 %v3273_v24  ;;  %v3980_v23 = vld [vmem:[#allocation31_spill] sm:$0xff]  ;;  %v3981_v24 = vmov 0.0  }
 0x62e   :  { %1816 = vmatpush1.msra.mxu0 %v3276_v25  ;;  %1887 = vmatpush1.msra.mxu1 %v3279_v26  ;;  %v3982_v25 = vld [vmem:[#allocation32_spill] sm:$0xff] }
 0x62f   :  { %1817 = vmatprep.subr.mxu0 %v3282_v27  ;;  %1888 = vmatprep.subr.mxu1 %v3285_v28 }
 0x630   :  { %1818 = vmatpush1.msra.mxu0 %v3288_v29  ;;  %1889 = vmatpush1.msra.mxu1 %v3291_v30 }
 0x631   :  { %1819 = vmatprep.subr.mxu0 %v3294_v10  ;;  %1890 = vmatprep.subr.mxu1 %v3297_v31 }
 0x632   :  { %1820 = vmatpush1.msra.mxu0 %v3300_v33  ;;  %1891 = vmatpush1.msra.mxu1 %v3303_v36 }
 0x633   :  { %1821 = vmatprep.subr.mxu0 %v3306_v37  ;;  %1892 = vmatprep.subr.mxu1 %v3309_v38 }
 0x634   :  { %1822 = vmatpush1.msra.mxu0 %v3312_v39  ;;  %1893 = vmatpush1.msra.mxu1 %v3315_v40 }
 0x635   :  { %1823 = vmatprep.subr.mxu0 %v3318_v41  ;;  %1894 = vmatprep.subr.mxu1 %v3321_v42 }
 0x636   :  { %1824 = vmatpush1.msra.mxu0 %v3324_v43  ;;  %1895 = vmatpush1.msra.mxu1 %v3327_v44 }
 0x637   :  { %1825 = vmatprep.subr.mxu0 %v3330_v45  ;;  %1896 = vmatprep.subr.mxu1 %v3333_v46 }
 0x638   :  { %1826 = vmatpush1.msra.mxu0 %v3336_v47  ;;  %1897 = vmatpush1.msra.mxu1 %v3339_v56 }
 0x639   :  { %1827 = vmatprep.subr.mxu0 %v3962_v52  ;;  %1898 = vmatprep.subr.mxu1 %v3963_v60  ;;  %v514_v52 = vld [vmem:[%s3706_s4 + $0xc0] sm:$0xff]  ;;  %v513_v60 = vld [vmem:[%s3706_s4 + $0xb8] sm:$0xff] }
 0x63a   :  { %1828 = vmatpush1.msra.mxu0 %v3964_v57  ;;  %1899 = vmatpush1.msra.mxu1 %v3965_v53  ;;  %v512_v57 = vld [vmem:[%s3706_s4 + $0xb0] sm:$0xff]  ;;  %v511_v53 = vld [vmem:[%s3706_s4 + $0xa8] sm:$0xff] }
 0x63b   :  { %1829 = vmatprep.subr.mxu0 %v3966_v61  ;;  %1900 = vmatprep.subr.mxu1 %v3967_v4  ;;  %v510_v61 = vld [vmem:[%s3706_s4 + $0xa0] sm:$0xff]  ;;  %v509_v4 = vld [vmem:[%s3706_s4 + $0x98] sm:$0xff] }
 0x63c   :  { %1830 = vmatpush1.msra.mxu0 %v3968_v6  ;;  %1901 = vmatpush1.msra.mxu1 %v3969_v8  ;;  %v508_v6 = vld [vmem:[%s3706_s4 + $0x90] sm:$0xff]  ;;  %v507_v8 = vld [vmem:[%s3706_s4 + $0x88] sm:$0xff] }
 0x63d   :  { %1831 = vmatprep.subr.mxu0 %v3970_v12  ;;  %1902 = vmatprep.subr.mxu1 %v3971_v55  ;;  %v506_v12 = vld [vmem:[%s3706_s4 + $0x80] sm:$0xff]  ;;  %v3983_v55 = vld [vmem:[#allocation41_spill] sm:$0xff] }
 0x63e   :  { %1832 = vmatpush1.msra.mxu0 %v3972_v11  ;;  %1903 = vmatpush1.msra.mxu1 %v3973_v0  ;;  %v2015_v11 = vrot.slane %v3983_v55, 6  ;;  %v505_v0 = vld [vmem:[%s3706_s4 + $0x78] sm:$0xff] }
 0x63f   :  { %1833 = vmatprep.subr.mxu0 %v3974_v63  ;;  %1904 = vmatprep.subr.mxu1 %v3975_v49  ;;  %v504_v63 = vld [vmem:[%s3706_s4 + $0x70] sm:$0xff]  ;;  %v503_v49 = vld [vmem:[%s3706_s4 + $0x68] sm:$0xff] }
 0x640   :  { %1834 = vmatpush1.msra.mxu0 %v3976_v54  ;;  %1905 = vmatpush1.msra.mxu1 %v3977_v48  ;;  %v502_v54 = vld [vmem:[%s3706_s4 + $0x60] sm:$0xff]  ;;  %v501_v48 = vld [vmem:[%s3706_s4 + $0x58] sm:$0xff] }
 0x641   :  { %1835 = vmatprep.subr.mxu0 %v3978_v2  ;;  %1906 = vmatprep.subr.mxu1 %v3979_v22  ;;  %v500_v2 = vld [vmem:[%s3706_s4 + $0x50] sm:$0xff]  ;;  %v499_v22 = vld [vmem:[%s3706_s4 + $0x48] sm:$0xff] }
 0x642   :  { %1836 = vmatpush1.msra.mxu0 %v3980_v23  ;;  %1869 = vmatprep.mubr.f32.mxu0 %v3981_v24  ;;  %v498_v23 = vld [vmem:[%s3706_s4 + $0x40] sm:$0xff] }
 0x643   :  { %1907 = vmatpush1.msra.mxu1 %v3982_v25  ;;  %1940 = vmatprep.mubr.f32.mxu1 %v3981_v24  ;;  %v497_v25 = vld [vmem:[%s3706_s4 + $0x38] sm:$0xff] }
 0x644   :  { %2263 = vmatprep.subr.mxu0 %v3981_v24  ;;  %2298 = vmatprep.subr.mxu1 %v3981_v24 }
 0x6e3   :  { %v1683_v26 = vpop.f32.mrf.mxu0  ;;  %v1754_v30 = vpop.f32.mrf.mxu1 }
 0x6e4   :  { %v1763_v27 = vrot.slane %v1683_v26, 4  ;;  %v1765_v40 = vrot.slane %v1754_v30, 4  ;;  %v496_v26 = vld [vmem:[%s3706_s4 + $0x30] sm:$0xff] }
 0x6e5   :  { %v1685_v28 = vpop.f32.mrf.mxu0  ;;  %v1756_v37 = vpop.f32.mrf.mxu1  ;;  %v492_v30 = vld [vmem:[%s3706_s4 + $0x10] sm:$0xff] }
 0x6e6   :  { %v1771_v29 = vadd.f32 %v1763_v27, %v3960_v9  ;;  %v1764_v10 = vrot.slane %v1685_v28, 4  ;;  %v1766_v38 = vrot.slane %v1756_v37, 4  ;;  %v1773_v43 = vadd.f32 %v1765_v40, %v3939_v3  ;;  %v495_v27 = vld [vmem:[%s3706_s4 + $0x28] sm:$0xff]  ;;  %v494_v28 = vld [vmem:[%s3706_s4 + $0x20] sm:$0xff] }
 0x6e8   :  { %v2219_v31 = vmul.f32 -1.442695, %v1771_v29  ;;  %v1772_v33 = vadd.f32 %v1764_v10, %v3961_v18  ;;  %v1774_v39 = vadd.f32 %v1766_v38, %v3938_v51  ;;  %v493_v29 = vld [vmem:[%s3706_s4 + $0x18] sm:$0xff]  ;;  %v491_v10 = vld [vmem:[%s3706_s4 + $0x8] sm:$0xff] }
 0x6ea   :  { %2451 = vpow2.f32 %v2219_v31  ;;  %v2220_v36 = vmul.f32 -1.442695, %v1772_v33  ;;  %v2221_v41 = vmul.f32 -1.442695, %v1774_v39  ;;  %v490_v31 = vld [vmem:[%s3706_s4] sm:$0xff] }
 0x6ec   :  { %2453 = vpow2.f32 %v2220_v36 }
 0x6ed   :  { %2455 = vpow2.f32 %v2221_v41 }
 0x6f7   :  { %v2452_v42 = vpop.eup %2451 }
 0x6f8   :  { %v1778_v44 = vadd.f32 1.0, %v2452_v42 }
 0x6f9   :  { %v2454_v45 = vpop.eup %2453 }
 0x6fa   :  { %2457 = vrcp.f32 %v1778_v44  ;;  %v1784_v46 = vadd.f32 1.0, %v2454_v45  ;;  %v2456_v47 = vpop.eup %2455 }
 0x6fb   :  { %2459 = vtanh.f32 %v1773_v43  ;;  %v1791_v14 = vadd.f32 1.0, %v2456_v47 }
 0x6fc   :  { %2461 = vrcp.f32 %v1784_v46 }
 0x6fd   :  { %2463 = vrcp.f32 %v1791_v14 }
 0x707   :  { %v2458_v56 = vpop.eup %2457 }
 0x708   :  { %v2460_v17 = vpop.eup %2459 }
 0x709   :  { %v2462_v16 = vpop.eup %2461  ;;  %v1798_v59 = vmul.f32 %v2460_v17, %v2458_v56 }
 0x70a   :  { %v1797_v15 = vmul.f32 %v2462_v16, %v1795_v21  ;;  %v2464_v13 = vpop.eup %2463 }
 0x70c   :  { %v3559_v62 = vadd.f32 %v1798_v59, %v1797_v15 }
 0x70e   :  { %2465 = vtanh.f32 %v3559_v62 }
 0x71b   :  { %v2466_v35 = vpop.eup %2465 }
 0x71c   :  { %v1801_v34 = vmul.f32 %v2466_v35, %v2464_v13  ;;  %v1983_v35 = vrot.slane %v3559_v62, 6 }
 0x71e   :  { %v1803_v58 = vrot.slane %v1801_v34, 4 }
 0x720   :  { %1870 = vmatmul.mubr.f32.vlgmr.msra.gmra.mxu0 %v1803_v58  ;;  %1941 = vmatmul.mubr.f32.vlgmr.msra.gmra.mxu1 %v1803_v58 }
 0x721   :  { %2264 = vmatpush3.msra.mxu0 %v521_v20  ;;  %2295 = vmatprep.mubr.msk.f32.mxu0 %vm2595_vm2, %v3981_v24 }
 0x722   :  { %2265 = vmatprep.subr.mxu0 %v3981_v24  ;;  %2330 = vmatprep.mubr.msk.f32.mxu1 %vm2595_vm2, %v3981_v24 }
 0x723   :  { %2266 = vmatpush3.msra.mxu0 %v520_v32  ;;  %2299 = vmatpush3.msra.mxu1 %v505_v0 }
 0x724   :  { %2267 = vmatprep.subr.mxu0 %v3981_v24  ;;  %2300 = vmatprep.subr.mxu1 %v3981_v24 }
 0x725   :  { %2268 = vmatpush3.msra.mxu0 %v519_v19  ;;  %2301 = vmatpush3.msra.mxu1 %v504_v63 }
 0x726   :  { %2269 = vmatprep.subr.mxu0 %v3981_v24  ;;  %2302 = vmatprep.subr.mxu1 %v3981_v24 }
 0x727   :  { %2270 = vmatpush3.msra.mxu0 %v518_v50  ;;  %2303 = vmatpush3.msra.mxu1 %v503_v49 }
 0x728   :  { %2271 = vmatprep.subr.mxu0 %v3981_v24  ;;  %2304 = vmatprep.subr.mxu1 %v3981_v24 }
 0x729   :  { %2272 = vmatpush3.msra.mxu0 %v517_v7  ;;  %2305 = vmatpush3.msra.mxu1 %v502_v54 }
 0x72a   :  { %2273 = vmatprep.subr.mxu0 %v3981_v24  ;;  %2306 = vmatprep.subr.mxu1 %v3981_v24 }
 0x72b   :  { %2274 = vmatpush3.msra.mxu0 %v516_v5  ;;  %2307 = vmatpush3.msra.mxu1 %v501_v48 }
 0x72c   :  { %2275 = vmatprep.subr.mxu0 %v3981_v24  ;;  %2308 = vmatprep.subr.mxu1 %v3981_v24 }
 0x72d   :  { %2276 = vmatpush3.msra.mxu0 %v515_v1  ;;  %2309 = vmatpush3.msra.mxu1 %v500_v2  ;;  %v2228_v1 = vld [vmem:[%s3707_s5] ss:$0 sm:$0xff] }
 0x72e   :  { %2277 = vmatprep.subr.mxu0 %v3981_v24  ;;  %2310 = vmatprep.subr.mxu1 %v3981_v24 }
 0x72f   :  { %2278 = vmatpush3.msra.mxu0 %v514_v52  ;;  %2311 = vmatpush3.msra.mxu1 %v499_v22 }
 0x730   :  { %2279 = vmatprep.subr.mxu0 %v3981_v24  ;;  %2312 = vmatprep.subr.mxu1 %v3981_v24 }
 0x731   :  { %2280 = vmatpush3.msra.mxu0 %v513_v60  ;;  %2313 = vmatpush3.msra.mxu1 %v498_v23 }
 0x732   :  { %2281 = vmatprep.subr.mxu0 %v3981_v24  ;;  %2314 = vmatprep.subr.mxu1 %v3981_v24 }
 0x733   :  { %2282 = vmatpush3.msra.mxu0 %v512_v57  ;;  %2315 = vmatpush3.msra.mxu1 %v497_v25 }
 0x734   :  { %2283 = vmatprep.subr.mxu0 %v3981_v24  ;;  %2316 = vmatprep.subr.mxu1 %v3981_v24 }
 0x735   :  { %2284 = vmatpush3.msra.mxu0 %v511_v53  ;;  %2317 = vmatpush3.msra.mxu1 %v496_v26 }
 0x736   :  { %2285 = vmatprep.subr.mxu0 %v3981_v24  ;;  %2318 = vmatprep.subr.mxu1 %v3981_v24 }
 0x737   :  { %2286 = vmatpush3.msra.mxu0 %v510_v61  ;;  %2319 = vmatpush3.msra.mxu1 %v495_v27 }
 0x738   :  { %2287 = vmatprep.subr.mxu0 %v3981_v24  ;;  %2320 = vmatprep.subr.mxu1 %v3981_v24 }
 0x739   :  { %2288 = vmatpush3.msra.mxu0 %v509_v4  ;;  %2321 = vmatpush3.msra.mxu1 %v494_v28 }
 0x73a   :  { %2289 = vmatprep.subr.mxu0 %v3981_v24  ;;  %2322 = vmatprep.subr.mxu1 %v3981_v24 }
 0x73b   :  { %2290 = vmatpush3.msra.mxu0 %v508_v6  ;;  %2323 = vmatpush3.msra.mxu1 %v493_v29 }
 0x73c   :  { %2291 = vmatprep.subr.mxu0 %v3981_v24  ;;  %2324 = vmatprep.subr.mxu1 %v3981_v24 }
 0x73d   :  { %2292 = vmatpush3.msra.mxu0 %v507_v8  ;;  %2325 = vmatpush3.msra.mxu1 %v492_v30 }
 0x73e   :  { %2293 = vmatprep.subr.mxu0 %v3981_v24  ;;  %2326 = vmatprep.subr.mxu1 %v3981_v24 }
 0x73f   :  { %2294 = vmatpush3.msra.mxu0 %v506_v12  ;;  %2327 = vmatpush3.msra.mxu1 %v491_v10 }
 0x740   :  { %2296 = vmatmul.mubr.f32.vlgmr.msra.gmra.mxu0 %v2015_v11  ;;  %2328 = vmatprep.subr.mxu1 %v3981_v24 }
 0x741   :  { %2329 = vmatpush3.msra.mxu1 %v490_v31 }
 0x7e0   :  { %v1871_v33 = vpop.f32.mrf.mxu0  ;;  %v1942_v39 = vpop.f32.mrf.mxu1 }
 0x7e1   :  { %v1951_v36 = vrot.slane %v1871_v33, 2  ;;  %v1953_v47 = vrot.slane %v1942_v39, 2 }
 0x7e2   :  { %v1873_v37 = vpop.f32.mrf.mxu0  ;;  %v1944_v44 = vpop.f32.mrf.mxu1 }
 0x7e3   :  { %v1959_v38 = vadd.f32 %v1951_v36, %v3960_v9  ;;  %v1952_v40 = vrot.slane %v1873_v37, 2  ;;  %v1954_v45 = vrot.slane %v1944_v44, 2  ;;  %v1961_v17 = vadd.f32 %v1953_v47, %v3939_v3 }
 0x7e5   :  { %v2222_v41 = vmul.f32 -1.442695, %v1959_v38  ;;  %v1960_v42 = vadd.f32 %v1952_v40, %v3961_v18  ;;  %v1962_v46 = vadd.f32 %v1954_v45, %v3938_v51 }
 0x7e7   :  { %2467 = vpow2.f32 %v2222_v41  ;;  %v2223_v43 = vmul.f32 -1.442695, %v1960_v42  ;;  %v2224_v24 = vmul.f32 -1.442695, %v1962_v46 }
 0x7e9   :  { %2469 = vpow2.f32 %v2223_v43 }
 0x7ea   :  { %2471 = vpow2.f32 %v2224_v24 }
 0x7f4   :  { %v2468_v56 = vpop.eup %2467 }
 0x7f5   :  { %v1966_v21 = vadd.f32 1.0, %v2468_v56 }
 0x7f6   :  { %v2470_v16 = vpop.eup %2469 }
 0x7f7   :  { %2473 = vrcp.f32 %v1966_v21  ;;  %v1972_v9 = vadd.f32 1.0, %v2470_v16  ;;  %v2472_v59 = vpop.eup %2471 }
 0x7f8   :  { %2475 = vtanh.f32 %v1961_v17  ;;  %v1979_v34 = vadd.f32 1.0, %v2472_v59 }
 0x7f9   :  { %2477 = vrcp.f32 %v1972_v9 }
 0x7fa   :  { %2479 = vrcp.f32 %v1979_v34 }
 0x800   :  { %v2083_v18 = vpop.f32.mrf.mxu0 }
 0x802   :  { %v2297_v14 = vpop.f32.mrf.mxu0 }
 0x804   :  { %v2474_v15 = vpop.eup %2473 }
 0x805   :  { %v2476_v13 = vpop.eup %2475 }
 0x806   :  { %v2478_v51 = vpop.eup %2477  ;;  %v1986_v58 = vmul.f32 %v2476_v13, %v2474_v15 }
 0x807   :  { %v1985_v20 = vmul.f32 %v2478_v51, %v1983_v35  ;;  %v2480_v3 = vpop.eup %2479 }
 0x809   :  { %v1987_v32 = vadd.f32 %v1986_v58, %v1985_v20 }
 0x80b   :  { %2481 = vtanh.f32 %v1987_v32 }
 0x818   :  { %v2482_v19 = vpop.eup %2481 }
 0x819   :  { %v1989_v50 = vmul.f32 %v2482_v19, %v2480_v3 }
 0x81b   :  { %v2088_v7 = vrot.slane %v1989_v50, 6 }
 0x81d   :  { %2331 = vmatmul.mubr.f32.vlgmr.msra.gmra.mxu1 %v2088_v7 }
 0x8dd   :  { %v2156_v5 = vpop.f32.mrf.mxu1 }
 0x8de   :  { %v2157_v62 = vadd.f32 %v2156_v5, %v2083_v18 }
 0x8df   :  { %v2332_v52 = vpop.f32.mrf.mxu1 }
 0x8e0   :  { %v2167_v60 = vadd.f32 %v2228_v1, %v2157_v62 }
 0x8e2   :  { %2169 = vst.msk [vmem:[#allocation5] sm:$0x3] %vm2168_vm3, %v2167_v60 }
 0x8e3   :  { %2578 = shalt.err (!%p2575_p9)
}
 0x8e4   :  { %2179 = dma.vmem_to_hbm [thread:$0]  %s2177_s8, 32, %s3708_s6, [#allocation4]  }
 0x8e5   :  { %2589 = dma.done.wait [#allocation4], 32  }
 0x8e6   :  { %2590 = vsyncadd [#allocation4], 4294967264 }
 0x8e7   :  { %2183 = vsyncpa [#allocation3], 1 }
 0x8e8   :  { %2184 = vsyncpa [#allocation4], 1 }

</bundles_post_ra>
